<compile_context>
chip_gen: v5e
topology: v5e:2x2
jax: 0.10.0
libtpu: 0.0.40
codegen_flags: <defaults>
</compile_context>

<pallas_src>
import functools
import math

import jax
import jax.numpy as jnp
import numpy as np
from jax.experimental import pallas as pl
from jax.experimental.pallas import tpu as pltpu

LN_EPS = 1e-5
MASK_NEG = -1e30
_TILE_ALIGN = 128            # every blocked sequence dim is a multiple of 128 (lane dense)
_SQRT_HALF = 1.0 / math.sqrt(2.0)


# ------------------------------ small helpers ------------------------------
def _round_up(x: int, m: int) -> int:
    return ((x + m - 1) // m) * m


def _pick_tile(total: int, want: int) -> int:
    cap = _round_up(total, _TILE_ALIGN)
    return max(_TILE_ALIGN, min(_round_up(want, _TILE_ALIGN), cap))


def _derive_vmem_limit():
    # Per-generation budget: ~80% of physical VMEM.  Leaves Mosaic-scratch headroom on
    # v7x (64 MiB physical) and stops artificially capping tiles on v5e/v6e (128 MiB).
    try:
        cap = getattr(pltpu.get_tpu_info(), "vmem_capacity_bytes", None)
        return int(cap * 0.8) if cap else None
    except Exception:
        return None


def _compiler_params(dim_semantics):
    kw = dict(dimension_semantics=dim_semantics)
    lim = _derive_vmem_limit()
    if lim is not None:
        kw["vmem_limit_bytes"] = lim
    return pltpu.CompilerParams(**kw)


def _const_spec(arr):
    """Whole-array spec with a constant index map; single-buffered (weights/LN/bias)."""
    nd = arr.ndim
    idx = lambda *_args, _nd=nd: (0,) * _nd
    try:
        return pl.BlockSpec(arr.shape, idx, pipeline_mode=pl.Buffered(1))
    except Exception:                      # older jax without pipeline_mode / Buffered
        return pl.BlockSpec(arr.shape, idx)


def _layer_norm(v, g, b):
    mu = jnp.mean(v, axis=-1, keepdims=True)
    var = jnp.mean((v - mu) ** 2, axis=-1, keepdims=True)
    return (v - mu) * jax.lax.rsqrt(var + LN_EPS) * g + b


def _erf(x):
    # Abramowitz & Stegun 7.1.26 (|error| <= 1.5e-7).  Built only from exp/mul/add/div/
    # select, so it lowers on Mosaic without relying on an erf primitive.
    p = 0.3275911
    a1, a2, a3, a4, a5 = (0.254829592, -0.284496736, 1.421413741,
                          -1.453152027, 1.061405429)
    sgn = jnp.where(x < 0, -1.0, 1.0).astype(x.dtype)
    ax = jnp.abs(x)
    t = 1.0 / (1.0 + p * ax)
    poly = ((((a5 * t + a4) * t + a3) * t + a2) * t + a1) * t
    return sgn * (1.0 - poly * jnp.exp(-(ax * ax)))


def _gelu_exact(x):
    # nn.GELU() default = exact erf formulation.
    return 0.5 * x * (1.0 + _erf(x * _SQRT_HALF))


# -------------------- stage 1: LN1 + fused QKV projection --------------------
def _qkv_proj_kernel(x_ref, ln1g_ref, ln1b_ref, wqkv_ref, bqkv_ref, q_ref, kv_ref, *, dim):
    f32 = jnp.float32
    x = x_ref[...].astype(f32)                                       # (ts, D)
    xn = _layer_norm(x, ln1g_ref[...], ln1b_ref[...])
    qkv = jnp.dot(xn.astype(wqkv_ref.dtype), wqkv_ref[...],
                  preferred_element_type=f32) + bqkv_ref[...]        # (ts, 3D) f32
    qkv = qkv.astype(q_ref.dtype)                                    # one full-width cast
    # lane-dense (ts, D) stores (D is a lane multiple) — no masked sub-128 stores
    q_ref[...] = qkv[:, :dim]
    kv_ref[0] = qkv[:, dim:2 * dim]
    kv_ref[1] = qkv[:, 2 * dim:]


# --------- stage 2: flash attention (key-tiled) + out-proj + FF sublayer ---------
def _attn_ff_kernel(x_ref, mb_ref, q_ref, kv_ref, wo_ref, bo_ref,
                    ln2g_ref, ln2b_ref, w1_ref, b1_ref, w2_ref, b2_ref,
                    o_ref, m_sc, l_sc, acc_sc, *, num_heads, d_head):
    f32 = jnp.float32
    ki = pl.program_id(2)

    @pl.when(ki == 0)
    def _init():
        m_sc[...] = jnp.full_like(m_sc, -jnp.inf)
        l_sc[...] = jnp.zeros_like(l_sc)
        acc_sc[...] = jnp.zeros_like(acc_sc)

    q = q_ref[...]                         # (tq, D) bf16 (1/sqrt(dh) folded into Wq)
    kv = kv_ref[...]                       # (2, tk, D) bf16
    k2, v2 = kv[0], kv[1]
    mb = mb_ref[...]                       # (1, tk) f32 additive key-padding bias

    dh = d_head
    dn = (((1,), (1,)), ((), ()))          # 'qd,kd->qk' — no k.T materialized
    s = jnp.stack(
        [jax.lax.dot_general(q[:, h * dh:(h + 1) * dh], k2[:, h * dh:(h + 1) * dh],
                             dn, preferred_element_type=f32)
         for h in range(num_heads)])                                 # (H, tq, tk) f32
    s = s + mb[None]                       # bias stays f32 (never cast to bf16)

    # online softmax across the key grid axis (flash-style): VMEM independent of S.
    # NOTE: a fully-masked query row yields a uniform distribution (PyTorch -> NaN);
    # this only affects padded query rows, which are sliced off by the wrapper.
    m_prev = m_sc[...]
    m_new = jnp.maximum(m_prev, jnp.max(s, axis=-1, keepdims=True))
    alpha = jnp.exp(m_prev - m_new)
    p = jnp.exp(s - m_new)
    l_sc[...] = alpha * l_sc[...] + jnp.sum(p, axis=-1, keepdims=True)
    pb = p.astype(q.dtype)
    pv = jnp.stack(
        [jnp.dot(pb[h], v2[:, h * dh:(h + 1) * dh], preferred_element_type=f32)
         for h in range(num_heads)])                                 # (H, tq, dh) f32
    acc_sc[...] = alpha * acc_sc[...] + pv
    m_sc[...] = m_new

    @pl.when(ki == pl.num_programs(2) - 1)
    def _finalize():
        inv_l = pl.reciprocal(l_sc[...], approx=True)                # EUP slot
        o_heads = acc_sc[...] * inv_l                                # (H, tq, dh) f32
        # fused head-merge + out-projection: ONE K=D MXU matmul, no (H,tq,D) temp, no VPU sum
        o_merged = jnp.concatenate([o_heads[h] for h in range(num_heads)], axis=-1)
        attn = jnp.dot(o_merged.astype(wo_ref.dtype), wo_ref[...],
                       preferred_element_type=f32) + bo_ref[...]     # (tq, D)

        x1 = x_ref[...].astype(f32) + attn        # residual; dropout == identity (eval)

        xn2 = _layer_norm(x1, ln2g_ref[...], ln2b_ref[...])
        h1 = jnp.dot(xn2.astype(w1_ref.dtype), w1_ref[...],
                     preferred_element_type=f32) + b1_ref[...]
        h1 = _gelu_exact(h1)
        y = jnp.dot(h1.astype(w2_ref.dtype), w2_ref[...],
                    preferred_element_type=f32) + b2_ref[...]
        o_ref[...] = (x1 + y).astype(o_ref.dtype)


# ------------------------------------ wrapper ------------------------------------
def eeg_transformer_layer(x, params, num_heads: int, attention_mask=None, *,
                          q_tile: int = 256, k_tile: int = 512, proj_tile: int = 256,
                          matmul_dtype=jnp.bfloat16):
    """x: (B, S, D) f32.  attention_mask: optional (B, S) bool, True = attend (key kept)."""
    B, S, D = x.shape
    assert D % num_heads == 0
    dh = D // num_heads
    scale = 1.0 / math.sqrt(dh)

    ts = _pick_tile(S, proj_tile)
    tq = _pick_tile(S, q_tile)
    tk = _pick_tile(S, k_tile)
    S_pad = _round_up(S, math.lcm(ts, tq, tk))

    # pad the sequence to a tile multiple; padded keys are masked, padded queries sliced off
    x_p = x if S_pad == S else jnp.pad(x, ((0, 0), (0, S_pad - S), (0, 0)))
    valid = (jnp.ones((B, S), bool) if attention_mask is None
             else attention_mask.astype(bool))
    if S_pad != S:
        valid = jnp.pad(valid, ((0, 0), (0, S_pad - S)), constant_values=False)
    mask_bias = jnp.where(valid, 0.0, MASK_NEG).astype(jnp.float32)[:, None, :]  # (B,1,S_pad)

    # ---- torch-layout weights -> row-major; fold 1/sqrt(dh) into Q; bf16 MXU operands ----
    q_fold = jnp.concatenate([jnp.full((D,), scale, jnp.float32),
                              jnp.ones((2 * D,), jnp.float32)])
    wqkv = (params["w_in"] * q_fold[:, None]).T.astype(matmul_dtype)        # (D, 3D)
    bqkv = (params["b_in"] * q_fold).reshape(1, 3 * D).astype(jnp.float32)
    wo = params["w_out"].T.astype(matmul_dtype)                             # (D, D)
    bo = params["b_out"].reshape(1, D).astype(jnp.float32)
    w1 = params["w1"].T.astype(matmul_dtype)                                # (D, 4D)
    b1 = params["b1"].reshape(1, 4 * D).astype(jnp.float32)
    w2 = params["w2"].T.astype(matmul_dtype)                                # (4D, D)
    b2 = params["b2"].reshape(1, D).astype(jnp.float32)
    ln1g = params["ln1_g"].reshape(1, D).astype(jnp.float32)
    ln1b = params["ln1_b"].reshape(1, D).astype(jnp.float32)
    ln2g = params["ln2_g"].reshape(1, D).astype(jnp.float32)
    ln2b = params["ln2_b"].reshape(1, D).astype(jnp.float32)

    # ---- stage 1: LN1 + QKV projection -> lane-dense q (B,S,D), fused kv (B,2,S,D) ----
    qkv_kernel = functools.partial(_qkv_proj_kernel, dim=D)
    ce1 = pl.CostEstimate(
        flops=int(2 * B * S_pad * D * 3 * D),
        transcendentals=int(B * S_pad),
        bytes_accessed=int(B * S_pad * D * 4 + 3 * D * D * 2 + B * S_pad * 3 * D * 2))
    q, kv = pl.pallas_call(
        qkv_kernel,
        out_shape=(jax.ShapeDtypeStruct((B, S_pad, D), matmul_dtype),
                   jax.ShapeDtypeStruct((B, 2, S_pad, D), matmul_dtype)),
        grid_spec=pltpu.PrefetchScalarGridSpec(
            num_scalar_prefetch=0,
            grid=(B, S_pad // ts),
            in_specs=[
                pl.BlockSpec((None, ts, D), lambda b, si: (b, si, 0)),
                _const_spec(ln1g), _const_spec(ln1b),
                _const_spec(wqkv), _const_spec(bqkv),
            ],
            out_specs=[
                pl.BlockSpec((None, ts, D), lambda b, si: (b, si, 0)),
                pl.BlockSpec((None, 2, ts, D), lambda b, si: (b, 0, si, 0)),
            ],
        ),
        compiler_params=_compiler_params(("parallel", "parallel")),
        cost_estimate=ce1,
    )(x_p, ln1g, ln1b, wqkv, bqkv)

    # ---- stage 2: flash attention over keys + out-proj + residual + LN2 + FF + residual ----
    attn_kernel = functools.partial(_attn_ff_kernel, num_heads=num_heads, d_head=dh)
    ce2 = pl.CostEstimate(
        flops=int(4 * B * S_pad * S_pad * D + 18 * B * S_pad * D * D),
        transcendentals=int(B * num_heads * S_pad * S_pad + 5 * B * S_pad * D),
        bytes_accessed=int(B * S_pad * D * 14 + 9 * D * D * 2 + B * S_pad * 4))
    out = pl.pallas_call(
        attn_kernel,
        out_shape=jax.ShapeDtypeStruct((B, S_pad, D), x.dtype),
        grid_spec=pltpu.PrefetchScalarGridSpec(
            num_scalar_prefetch=0,
            grid=(B, S_pad // tq, S_pad // tk),
            in_specs=[
                pl.BlockSpec((None, tq, D), lambda b, qi, ki: (b, qi, 0)),        # x residual
                pl.BlockSpec((None, 1, tk), lambda b, qi, ki: (b, 0, ki)),        # mask bias
                pl.BlockSpec((None, tq, D), lambda b, qi, ki: (b, qi, 0)),        # q
                pl.BlockSpec((None, 2, tk, D), lambda b, qi, ki: (b, 0, ki, 0)),  # fused k+v
                _const_spec(wo), _const_spec(bo),
                _const_spec(ln2g), _const_spec(ln2b),
                _const_spec(w1), _const_spec(b1),
                _const_spec(w2), _const_spec(b2),
            ],
            out_specs=pl.BlockSpec((None, tq, D), lambda b, qi, ki: (b, qi, 0)),
            scratch_shapes=[
                pltpu.VMEM((num_heads, tq, 1), jnp.float32),    # running max  m
                pltpu.VMEM((num_heads, tq, 1), jnp.float32),    # running sum  l
                pltpu.VMEM((num_heads, tq, dh), jnp.float32),   # output accumulator
            ],
        ),
        compiler_params=_compiler_params(("parallel", "parallel", "arbitrary")),
        cost_estimate=ce2,
    )(x_p, mask_bias, q, kv, wo, bo, ln2g, ln2b, w1, b1, w2, b2)

    return out if S_pad == S else out[:, :S]


# ------------------------------ params (torch layouts) ------------------------------
def init_params(key, dim: int):
    ks = jax.random.split(key, 6)
    s = 0.02
    return {
        "ln1_g": jnp.ones((dim,), jnp.float32),
        "ln1_b": jnp.zeros((dim,), jnp.float32),
        "w_in": jax.random.normal(ks[0], (3 * dim, dim), jnp.float32) * s,   # in_proj_weight
        "b_in": jax.random.normal(ks[1], (3 * dim,), jnp.float32) * s,
        "w_out": jax.random.normal(ks[2], (dim, dim), jnp.float32) * s,      # out_proj
        "b_out": jnp.zeros((dim,), jnp.float32),
        "ln2_g": jnp.ones((dim,), jnp.float32),
        "ln2_b": jnp.zeros((dim,), jnp.float32),
        "w1": jax.random.normal(ks[3], (4 * dim, dim), jnp.float32) * s,     # Linear(D, 4D)
        "b1": jax.random.normal(ks[4], (4 * dim,), jnp.float32) * s,
        "w2": jax.random.normal(ks[5], (dim, 4 * dim), jnp.float32) * s,     # Linear(4D, D)
        "b2": jnp.zeros((dim,), jnp.float32),
    }


# ---------------------- pure-JAX f32 reference (PyTorch semantics) ----------------------
def reference(x, params, num_heads, attention_mask=None):
    B, S, D = x.shape
    dh = D // num_heads

    def ln(v, g, b):
        mu = jnp.mean(v, -1, keepdims=True)
        var = jnp.mean((v - mu) ** 2, -1, keepdims=True)
        return (v - mu) / jnp.sqrt(var + LN_EPS) * g + b

    res = x
    xn = ln(x, params["ln1_g"], params["ln1_b"])
    qkv = xn @ params["w_in"].T + params["b_in"]
    q, k, v = jnp.split(qkv, 3, axis=-1)
    q = q.reshape(B, S, num_heads, dh).transpose(0, 2, 1, 3) / math.sqrt(dh)
    k = k.reshape(B, S, num_heads, dh).transpose(0, 2, 1, 3)
    v = v.reshape(B, S, num_heads, dh).transpose(0, 2, 1, 3)
    s = jnp.einsum("bhqd,bhkd->bhqk", q, k)
    if attention_mask is not None:
        s = s + jnp.where(attention_mask, 0.0, MASK_NEG)[:, None, None, :]
    p = jax.nn.softmax(s, axis=-1)
    o = jnp.einsum("bhqk,bhkd->bhqd", p, v).transpose(0, 2, 1, 3).reshape(B, S, D)
    o = o @ params["w_out"].T + params["b_out"]
    x1 = res + o
    xn2 = ln(x1, params["ln2_g"], params["ln2_b"])
    h = xn2 @ params["w1"].T + params["b1"]
    h = 0.5 * h * (1.0 + jax.lax.erf(h / jnp.sqrt(2.0)))     # exact-erf GELU
    y = h @ params["w2"].T + params["b2"]
    return x1 + y


if __name__ == "__main__":
    # S is deliberately NOT a tile multiple and tiles are set to 128 so the run exercises
    # sequence padding, multiple query tiles and the multi-step online-softmax path even at
    # toy shapes.  (Production defaults are 256/512-sized tiles per the v6e/v7x guidance.)
    B, S, D, H = 2, 320, 128, 4
    key = jax.random.PRNGKey(0)
    kx, kp = jax.random.split(key)

    x = jax.random.normal(kx, (B, S, D), jnp.float32)
    params = init_params(kp, D)
    # attention_mask: True = valid token (last 16 keys of batch 1 are padding)
    attention_mask = jnp.ones((B, S), bool).at[1, -16:].set(False)

    out = eeg_transformer_layer(x, params, num_heads=H, attention_mask=attention_mask,
                                q_tile=128, k_tile=128, proj_tile=128)
    out = jax.block_until_ready(out)
    assert out.shape == (B, S, D)

    # Tolerance accounts for bf16 MXU operands (f32 accumulation) and the approx reciprocal.
    ref = reference(x, params, H, attention_mask)
    np.testing.assert_allclose(np.asarray(out), np.asarray(ref), atol=2e-2, rtol=2e-2)

    print("KERNEL_OK")
</pallas_src>

<mosaic_0001>
module attributes {stable_mosaic.version = 11 : i64} {
  func.func @_qkv_proj_kernel(%arg0: i32, %arg1: i32, %arg2: memref<1x128x128xf32, #tpu.memory_space<vmem>>, %arg3: memref<1x128xf32, #tpu.memory_space<vmem>>, %arg4: memref<1x128xf32, #tpu.memory_space<vmem>>, %arg5: memref<128x384xbf16, #tpu.memory_space<vmem>>, %arg6: memref<1x384xf32, #tpu.memory_space<vmem>>, %arg7: memref<1x128x128xbf16, #tpu.memory_space<vmem>>, %arg8: memref<1x2x128x128xbf16, #tpu.memory_space<vmem>>) attributes {dimension_semantics = [#tpu.dimension_semantics<parallel>, #tpu.dimension_semantics<parallel>], iteration_bounds = array<i64: 2, 3>, scalar_prefetch = 0 : i64, scratch_operands = 0 : i64, tpu.core_type = #tpu.core_type<tc>, window_params = [{transform_indices = @transform_0, window_bounds = array<i64: 1, 128, 128>}, {pipeline_mode = #tpu.pipeline_mode<synchronous>, transform_indices = @transform_1, window_bounds = array<i64: 1, 128>}, {pipeline_mode = #tpu.pipeline_mode<synchronous>, transform_indices = @transform_2, window_bounds = array<i64: 1, 128>}, {pipeline_mode = #tpu.pipeline_mode<synchronous>, transform_indices = @transform_3, window_bounds = array<i64: 128, 384>}, {pipeline_mode = #tpu.pipeline_mode<synchronous>, transform_indices = @transform_4, window_bounds = array<i64: 1, 384>}, {transform_indices = @transform_5, window_bounds = array<i64: 1, 128, 128>}, {transform_indices = @transform_6, window_bounds = array<i64: 1, 2, 128, 128>}]} {
    %c0 = arith.constant 0 : index
    %c0_0 = arith.constant 0 : index
    %c0_1 = arith.constant 0 : index
    %0 = vector.load %arg2[%c0, %c0_0, %c0_1] : memref<1x128x128xf32, #tpu.memory_space<vmem>>, vector<1x128x128xf32>
    %1 = vector.shape_cast %0 : vector<1x128x128xf32> to vector<128x128xf32>
    %c0_2 = arith.constant 0 : index
    %c0_3 = arith.constant 0 : index
    %2 = vector.load %arg3[%c0_2, %c0_3] : memref<1x128xf32, #tpu.memory_space<vmem>>, vector<1x128xf32>
    %c0_4 = arith.constant 0 : index
    %c0_5 = arith.constant 0 : index
    %3 = vector.load %arg4[%c0_4, %c0_5] : memref<1x128xf32, #tpu.memory_space<vmem>>, vector<1x128xf32>
    %cst = arith.constant dense<0.000000e+00> : vector<128xf32>
    %4 = vector.multi_reduction <add>, %1, %cst [1] : vector<128x128xf32> to vector<128xf32>
    %5 = vector.shape_cast %4 : vector<128xf32> to vector<128x1xf32>
    %cst_6 = arith.constant 1.280000e+02 : f32
    %6 = vector.broadcast %cst_6 : f32 to vector<128x1xf32>
    %7 = arith.divf %5, %6 : vector<128x1xf32>
    %8 = vector.broadcast %7 : vector<128x1xf32> to vector<128x128xf32>
    %9 = arith.subf %1, %8 : vector<128x128xf32>
    %10 = arith.mulf %9, %9 : vector<128x128xf32>
    %cst_7 = arith.constant dense<0.000000e+00> : vector<128xf32>
    %11 = vector.multi_reduction <add>, %10, %cst_7 [1] : vector<128x128xf32> to vector<128xf32>
    %12 = vector.shape_cast %11 : vector<128xf32> to vector<128x1xf32>
    %cst_8 = arith.constant 1.280000e+02 : f32
    %13 = vector.broadcast %cst_8 : f32 to vector<128x1xf32>
    %14 = arith.divf %12, %13 : vector<128x1xf32>
    %15 = vector.broadcast %7 : vector<128x1xf32> to vector<128x128xf32>
    %16 = arith.subf %1, %15 : vector<128x128xf32>
    %cst_9 = arith.constant 9.99999974E-6 : f32
    %17 = vector.broadcast %cst_9 : f32 to vector<128x1xf32>
    %18 = arith.addf %14, %17 : vector<128x1xf32>
    %19 = math.rsqrt %18 : vector<128x1xf32>
    %20 = vector.broadcast %19 : vector<128x1xf32> to vector<128x128xf32>
    %21 = arith.mulf %16, %20 : vector<128x128xf32>
    %22 = vector.broadcast %2 : vector<1x128xf32> to vector<128x128xf32>
    %23 = arith.mulf %21, %22 : vector<128x128xf32>
    %24 = vector.broadcast %3 : vector<1x128xf32> to vector<128x128xf32>
    %25 = arith.addf %23, %24 : vector<128x128xf32>
    %26 = arith.truncf %25 : vector<128x128xf32> to vector<128x128xbf16>
    %c0_10 = arith.constant 0 : index
    %c0_11 = arith.constant 0 : index
    %27 = vector.load %arg5[%c0_10, %c0_11] : memref<128x384xbf16, #tpu.memory_space<vmem>>, vector<128x384xbf16>
    %cst_12 = arith.constant dense<0.000000e+00> : vector<128x384xf32>
    %28 = tpu.matmul %26, %27, %cst_12 {dimension_numbers = #tpu.dot_dimension_numbers<[1], [0], [0], [1], [0, 0, 1, 1], [], []>} : vector<128x128xbf16>, vector<128x384xbf16>, vector<128x384xf32> -> vector<128x384xf32>
    %c0_13 = arith.constant 0 : index
    %c0_14 = arith.constant 0 : index
    %29 = vector.load %arg6[%c0_13, %c0_14] : memref<1x384xf32, #tpu.memory_space<vmem>>, vector<1x384xf32>
    %30 = vector.broadcast %29 : vector<1x384xf32> to vector<128x384xf32>
    %31 = arith.addf %28, %30 : vector<128x384xf32>
    %32 = arith.truncf %31 : vector<128x384xf32> to vector<128x384xbf16>
    %33 = vector.extract_strided_slice %32 {offsets = [0, 0], sizes = [128, 128], strides = [1, 1]} : vector<128x384xbf16> to vector<128x128xbf16>
    %c0_15 = arith.constant 0 : index
    %c0_16 = arith.constant 0 : index
    %c0_17 = arith.constant 0 : index
    %34 = vector.load %arg7[%c0_15, %c0_16, %c0_17] : memref<1x128x128xbf16, #tpu.memory_space<vmem>>, vector<1x128x128xbf16>
    %35 = vector.shape_cast %34 : vector<1x128x128xbf16> to vector<128x128xbf16>
    %36 = vector.shape_cast %33 : vector<128x128xbf16> to vector<1x128x128xbf16>
    tpu.vector_store %arg7[%c0_15, %c0_16, %c0_17], %36 {strides = array<i32>} : memref<1x128x128xbf16, #tpu.memory_space<vmem>>, vector<1x128x128xbf16>,
    %37 = vector.extract_strided_slice %32 {offsets = [0, 128], sizes = [128, 128], strides = [1, 1]} : vector<128x384xbf16> to vector<128x128xbf16>
    %c0_18 = arith.constant 0 : index
    %c0_19 = arith.constant 0 : index
    %c0_20 = arith.constant 0 : index
    %c0_21 = arith.constant 0 : index
    %38 = vector.load %arg8[%c0_18, %c0_19, %c0_20, %c0_21] : memref<1x2x128x128xbf16, #tpu.memory_space<vmem>>, vector<1x1x128x128xbf16>
    %39 = vector.shape_cast %38 : vector<1x1x128x128xbf16> to vector<128x128xbf16>
    %40 = vector.shape_cast %37 : vector<128x128xbf16> to vector<1x1x128x128xbf16>
    tpu.vector_store %arg8[%c0_18, %c0_19, %c0_20, %c0_21], %40 {strides = array<i32>} : memref<1x2x128x128xbf16, #tpu.memory_space<vmem>>, vector<1x1x128x128xbf16>,
    %41 = vector.extract_strided_slice %32 {offsets = [0, 256], sizes = [128, 128], strides = [1, 1]} : vector<128x384xbf16> to vector<128x128xbf16>
    %c0_22 = arith.constant 0 : index
    %c1 = arith.constant 1 : index
    %c0_23 = arith.constant 0 : index
    %c0_24 = arith.constant 0 : index
    %42 = vector.load %arg8[%c0_22, %c1, %c0_23, %c0_24] : memref<1x2x128x128xbf16, #tpu.memory_space<vmem>>, vector<1x1x128x128xbf16>
    %43 = vector.shape_cast %42 : vector<1x1x128x128xbf16> to vector<128x128xbf16>
    %44 = vector.shape_cast %41 : vector<128x128xbf16> to vector<1x1x128x128xbf16>
    tpu.vector_store %arg8[%c0_22, %c1, %c0_23, %c0_24], %44 {strides = array<i32>} : memref<1x2x128x128xbf16, #tpu.memory_space<vmem>>, vector<1x1x128x128xbf16>,
    return
  }
  func.func @transform_0(%arg0: i32, %arg1: i32) -> (i32, i32, i32) {
    %c0_i32 = arith.constant 0 : i32
    %c0_i32_0 = arith.constant 0 : i32
    return %arg0, %arg1, %c0_i32 : i32, i32, i32
  }
  func.func @transform_1(%arg0: i32, %arg1: i32) -> (i32, i32) {
    %c0_i32 = arith.constant 0 : i32
    %c0_i32_0 = arith.constant 0 : i32
    %c0_i32_1 = arith.constant 0 : i32
    return %c0_i32, %c0_i32_0 : i32, i32
  }
  func.func @transform_2(%arg0: i32, %arg1: i32) -> (i32, i32) {
    %c0_i32 = arith.constant 0 : i32
    %c0_i32_0 = arith.constant 0 : i32
    %c0_i32_1 = arith.constant 0 : i32
    return %c0_i32, %c0_i32_0 : i32, i32
  }
  func.func @transform_3(%arg0: i32, %arg1: i32) -> (i32, i32) {
    %c0_i32 = arith.constant 0 : i32
    %c0_i32_0 = arith.constant 0 : i32
    %c0_i32_1 = arith.constant 0 : i32
    return %c0_i32, %c0_i32_0 : i32, i32
  }
  func.func @transform_4(%arg0: i32, %arg1: i32) -> (i32, i32) {
    %c0_i32 = arith.constant 0 : i32
    %c0_i32_0 = arith.constant 0 : i32
    %c0_i32_1 = arith.constant 0 : i32
    return %c0_i32, %c0_i32_0 : i32, i32
  }
  func.func @transform_5(%arg0: i32, %arg1: i32) -> (i32, i32, i32) {
    %c0_i32 = arith.constant 0 : i32
    %c0_i32_0 = arith.constant 0 : i32
    return %arg0, %arg1, %c0_i32 : i32, i32, i32
  }
  func.func @transform_6(%arg0: i32, %arg1: i32) -> (i32, i32, i32, i32) {
    %c0_i32 = arith.constant 0 : i32
    %c0_i32_0 = arith.constant 0 : i32
    %c0_i32_1 = arith.constant 0 : i32
    return %arg0, %c0_i32, %arg1, %c0_i32_0 : i32, i32, i32, i32
  }
}

</mosaic_0001>

<bundles_post_ra>
// kernel: tpu_custom_call.1
= control target key start
LH: loop header
LB: loop body
LE: loop exit
PB: predicated region body
PF: predicated region fallthrough
CT: control target
= control target key end

     0   :  { %s2894_s0 = inlined_call_operand.hbm [shape: f32[2,384,128], index: 0, kind: input, shape index: {}]   ;;  %s2895_s1 = inlined_call_operand.hbm [shape: f32[1,128], index: 1, kind: input, shape index: {}]   ;;  %s2896_s2 = inlined_call_operand.hbm [shape: f32[1,128], index: 2, kind: input, shape index: {}]   ;;  %s2897_s3 = inlined_call_operand.hbm [shape: bf16[128,384], index: 3, kind: input, shape index: {}]   ;;  %s2898_s4 = inlined_call_operand.vmem [shape: f32[1,384], index: 4, kind: input, shape index: {}]   ;;  %s2899_s5 = inlined_call_operand.hbm [shape: bf16[2,384,128], index: 5, kind: output, shape index: {0}]   ;;  %s2900_s6 = inlined_call_operand.hbm [shape: bf16[2,2,384,128], index: 6, kind: output, shape index: {1}]  }
   0x1   :  { %2907 = sst [smem:[#allocation25_spill]] %s2895_s1 }
   0x2   :  { %2908 = sst [smem:[#allocation26_spill]] %s2896_s2 }
   0x3   :  { %2909 = sst [smem:[#allocation27_spill]] %s2897_s3 }
   0x4   :  { %2910 = sst [smem:[#allocation28_spill]] %s2900_s6 }
   0x5   :  { %12 = vsyncpa [#allocation3], 0 }
   0x6   :  { %14 = vsyncpa [#allocation3 + $0x1], 0 }
   0x7   :  { %15 = vsyncpa [#allocation6], 0 }
   0x8   :  { %16 = vsyncpa [#allocation9], 0 }
   0x9   :  { %17 = vsyncpa [#allocation4], 0 }
   0xa   :  { %19 = vsyncpa [#allocation4 + $0x1], 0 }
   0xb   :  { %20 = vsyncpa [#allocation12], 0 }
   0xc   :  { %22 = vsyncpa [#allocation12 + $0x1], 0  ;;  %s2144_s21 = smov 0   ;;  %s2146_s22 = smov 0  }
   0xd   :  { %s2148_s23 = smov 0   ;;  %s2150_s24 = smov 0  }
   0xe   :  { %s2152_s25 = smov 0   ;;  %s2154_s26 = smov 0  }
   0xf   :  { %s2156_s27 = smov 0   ;;  %s2158_s28 = smov 0  }
  0x10 LB: > { %2911 = sst [smem:[#allocation20_spill]] %s2062_s21  ;;  %s1407_s29 = sadd.s32 4294967295, %s2090_s28   ;;  %s2090_s28 = sphi %s2158_s28, %s28_s28   ;;  %s2086_s27 = sphi %s2156_s27, %s2949_s27   ;;  %s2082_s26 = sphi %s2154_s26, %s2944_s26   ;;  %s2078_s25 = sphi %s2152_s25, %s2948_s25   ;;  %s2074_s24 = sphi %s2150_s24, %s2943_s24   ;;  %s2070_s23 = sphi %s2148_s23, %s2947_s23   ;;  %s2066_s22 = sphi %s2146_s22, %s2946_s22   ;;  %s2062_s21 = sphi %s2144_s21, %s2945_s21  }
  0x11   : > { %2912 = sst [smem:[#allocation21_spill]] %s2082_s26  ;;  %s1408_s30 = sadd.s32 4294967294, %s2090_s28  }
  0x12   : > { %p62_p0 = scmp.ne.s32.totalorder %s2066_s22, %s2062_s21  ;;  %p2188_p1 = scmp.eq.s32.totalorder %s1407_s29, 0 }
  0x13   : > { %p2192_p2 = scmp.eq.s32.totalorder %s1407_s29, 5  ;;  %p178_p3 = scmp.eq.s32.totalorder %s1408_s30, 5 }
  0x14   : > { %p2198_p4 = por %p2188_p1, %p62_p0  ;;  %p1409_p5 = scmp.ge.s32.totalorder %s2090_s28, 1 }
  0x15   : > { %p2203_p6 = por %p178_p3, %p62_p0  ;;  %p213_p7 = scmp.lt.s32.totalorder %s2090_s28, 7 }
  0x16   : > { %s2918_s1 = sld [smem:[#allocation25_spill]]  ;;  %s2092_s15 = smov [#allocation5]  }
  0x17   : > { %s2916_s10 = scalar_select %p2203_p6, 1, 0 }
  0x18   : > { %p2211_p8 = pnand %p1409_p5, %p213_p7  ;;  %s227_s16 = sshll.u32 %s2092_s15, 4  ;;  %s228_s16 = int_to_ptr.vmem [resolvable:$true] %s227_s16 }
  0x19   : > { %2917 = sst [smem:[#allocation22_spill]] %s2916_s10  ;;  %s2093_s12 = smov [#allocation7]  }
  0x1a   : > { %p1714_p9 = pneg %p2211_p8  ;;  %s2920_s2 = sld [smem:[#allocation26_spill]] }
  0x1b   : > { %s2922_s3 = sld [smem:[#allocation27_spill]]  ;;  %s239_s15 = sshll.u32 %s2093_s12, 4  ;;  %s240_s15 = int_to_ptr.vmem [resolvable:$true] %s239_s15 }
  0x1c   : > { %s225_s13 = sshll.u32 %s2918_s1, 4  ;;  %p2222_p10 = pnand %p1714_p9, %p2188_p1  ;;  %s226_s13 = int_to_ptr.hbm [resolvable:$true] %s225_s13 }
  0x1d   : > { %s2094_s17 = smov [#allocation8]   ;;  %s2095_s29 = smov 192  }
  0x1e   : > { %1717 = dma.hbm_to_vmem [thread:$0]  (!%p2222_p10), %s226_s13, 16, %s228_s16, [#allocation6]  }
  0x1f   : > { %s250_s18 = sshll.u32 %s2094_s17, 4  ;;  %s2096_s30 = smov 12   ;;  %s251_s18 = int_to_ptr.vmem [resolvable:$true] %s250_s18 }
  0x20   : > { %s237_s19 = sshll.u32 %s2920_s2, 4  ;;  %s37_s12 = sadd.s32 1, %s2082_s26  ;;  %s238_s19 = int_to_ptr.hbm [resolvable:$true] %s237_s19 }
  0x21   : > { %s248_s11 = sshll.u32 %s2922_s3, 4  ;;  %p38_p11 = scmp.ge.s32.totalorder %s37_s12, 3  ;;  %s249_s11 = int_to_ptr.hbm [resolvable:$true] %s248_s11 }
  0x22   : > { %1720 = dma.hbm_to_vmem [thread:$0]  (!%p2222_p10), %s238_s19, 16, %s240_s15, [#allocation6]  }
  0x23   : > { %1723 = dma.hbm_to_vmem [thread:$0]  (!%p2222_p10), %s249_s11, 3072, %s251_s18, [#allocation9], %s2095_s29, %s2095_s29, %s2096_s30  }
  0x24   : > { %s40_s13 = sadd.s32 1, %s2086_s27  ;;  %s49_s16 = sadd.s32 1, %s2070_s23 }
  0x25   : > { %p56_p12 = scmp.ne.s32.totalorder %s2070_s23, %s2066_s22  ;;  %s2951_s12 = smov (%p38_p11, %s37_s12), 0 }
  0x26   : > { %2923 = sst [smem:[#allocation23_spill]] %s2951_s12  ;;  %s2953_s13 = smov (!%p38_p11, %s40_s13), %s2086_s27 }
  0x27   : > { %s45_s19 = ssub.s32 %s2082_s26, %s2951_s12  ;;  %p57_p13 = scmp.eq.s32.totalorder %s2090_s28, 0 }
  0x28   : > { %p42_p0 = scmp.ge.s32.totalorder %s2953_s13, 2  ;;  %p2248_p3 = por %p2192_p2, %p56_p12 }
  0x29   : > { %p2252_p5 = por %p57_p13, %p56_p12  ;;  %p1738_p7 = scmp.lt.s32.totalorder %s2090_s28, 6 }
  0x2a   : > { %s2924_s20 = scalar_select %p2248_p3, 1, 0 }
  0x2b   : > { %s2955_s13 = smov (%p42_p0, %s2953_s13), 0  ;;  %s267_s15 = sand.u32 1, %s2070_s23  }
  0x2c   : > { %2925 = sst [smem:[#allocation24_spill]] %s2924_s20  ;;  %s1415_s17 = sshll.u32 %s2082_s26, 4 }
  0x2d   : > { %s44_s18 = ssub.s32 %s2086_s27, %s2955_s13  ;;  %s1414_s30 = sshll.u32 %s267_s15, 7 }
  0x2e   : > { %s46_s29 = sor.u32 %s45_s19, %s44_s18  ;;  %s1687_s8 = smul.u32 48, %s2086_s27 }
  0x2f   : > { %p47_p9 = scmp.eq.s32.totalorder %s46_s29, 0  ;;  %s271_s1 = scalar_lea.vmem [#allocation2], %s1414_s30 }
  0x30   : > { %s281_s2 = sshll.u32 %s271_s1, 4  ;;  %s276_s12 = sadd.s32 %s1687_s8, %s1415_s17  ;;  %s282_s2 = int_to_ptr.vmem [resolvable:$true] %s281_s2 }
  0x31   : > { %s2265_s3 = scalar_select %p47_p9, %s2070_s23, %s49_s16  }
  0x32   : > { %s1416_s10 = sshll.u32 %s276_s12, 3  ;;  %p1725_p2 = pnand %p1738_p7, %p2252_p5 }
  0x33   : > { %s278_s20 = scalar_lea.hbm %s2894_s0, %s1416_s10  ;;  %s268_s19 = scalar_lea.sflag [#allocation3], %s267_s15 }
  0x34   : > { %s279_s26 = sshll.u32 %s278_s20, 4  ;;  %s2097_s18 = smov 128   ;;  %s280_s26 = int_to_ptr.hbm [resolvable:$true] %s279_s26 }
  0x35   : > { %s2098_s29 = smov 8   ;;  %293 = sbr.rel (%p2211_p8) target bundleno = 661 (0x295), region = 40 }
  0x36   : > { %1727 = dma.hbm_to_vmem [thread:$0]  (!%p1725_p2), %s280_s26, 2048, %s282_s2, %s268_s19, %s2097_s18, %s2097_s18, %s2098_s29  }
  0x37   : > { %s2277_s1 = sand.u32 (!%p2211_p8), 1, %s2066_s22  }
  0x38   : > { %s1418_s12 = sshll.u32 (!%p2211_p8), %s2277_s1, 7  ;;  %s296_s16 = scalar_lea.sflag (!%p2211_p8), [#allocation3], %s2277_s1 }
  0x39   : > { %s2283_s6 = scalar_lea.vmem (!%p2211_p8), [#allocation2], %s1418_s12 }
  0x3a   : > { %2041 = dma.done.wait (%p2198_p4), %s296_s16, 2048  }
  0x3b   : > { %2043 = vsyncadd (%p2198_p4), %s296_s16, 4294965248 }
  0x3c   : > { %2045 = dma.done.wait (%p2188_p1), [#allocation6], 32  }
  0x3d   : > { %2047 = vsyncadd (%p2188_p1), [#allocation6], 4294967264 }
  0x3e   : > { %2049 = dma.done.wait (%p2188_p1), [#allocation9], 3072  }
  0x3f   : > { %2051 = vsyncadd (%p2188_p1), [#allocation9], 4294964224  ;;  %v364_v0 = vld [vmem:[%s2283_s6 + $0x60] sm:$0xff]  ;;  %v354_v2 = vld [vmem:[%s2283_s6 + $0x10] sm:$0xff]  ;;  %v2099_v10 = vmov 128.0   ;;  %s2700_s26 = scalar_lea.vmem [#allocation11], %s1418_s12 }
  0x40   : > { %v352_v1 = vld [vmem:[%s2283_s6] sm:$0xff]  ;;  %394 = vadd.xlane.f32.xlu1 %v364_v0  ;;  %374 = vadd.xlane.f32.xlu2 %v354_v2  ;;  %v365_v3 = vld [vmem:[%s2283_s6 + $0x68] sm:$0xff]  ;;  %v355_v5 = vld [vmem:[%s2283_s6 + $0x18] sm:$0xff]  ;;  %1826 = vrcp.f32 %v2099_v10  ;;  %s1422_s7 = sshll.u32 %s2277_s1, 6  ;;  %s1688_s10 = smul.u32 48, %s2078_s25 }
  0x41   : > { %370 = vadd.xlane.f32.xlu0 %v352_v1  ;;  %v353_v4 = vld [vmem:[%s2283_s6 + $0x8] sm:$0xff]  ;;  %v366_v6 = vld [vmem:[%s2283_s6 + $0x70] sm:$0xff]  ;;  %v367_v7 = vld [vmem:[%s2283_s6 + $0x78] sm:$0xff]  ;;  %s2715_s9 = scalar_lea.vmem [#allocation10], %s1422_s7  ;;  %s1538_s14 = sshll.u32 %s2074_s24, 4 }
  0x42   : > { %v356_v8 = vld [vmem:[%s2283_s6 + $0x20] sm:$0xff]  ;;  %v2307_v9 = vld [vmem:[%s2283_s6 + $0x28] sm:$0xff]  ;;  %v2330_v33 = vld [vmem:[%s2283_s6 + $0x38] sm:$0xff]  ;;  %s1204_s20 = sadd.s32 %s1688_s10, %s1538_s14  ;;  %s1207_s8 = sshll.u32 %s2715_s9, 4  ;;  %s1208_s8 = int_to_ptr.vmem [resolvable:$true] %s1207_s8 }
  0x43   : > { %v2347_v45 = vld [vmem:[%s2283_s6 + $0x30] sm:$0xff]  ;;  %v2362_v53 = vld [vmem:[%s2283_s6 + $0x48] sm:$0xff]  ;;  %v2374_v59 = vld [vmem:[%s2283_s6 + $0x40] sm:$0xff]  ;;  %s1539_s11 = sshll.u32 %s1204_s20, 2  ;;  %s1188_s29 = scalar_lea.sflag [#allocation4], %s2277_s1 }
  0x44   : > { %v2370_v57 = vld [vmem:[%s2283_s6 + $0x50] sm:$0xff]  ;;  %v2382_v61 = vld [vmem:[%s2283_s6 + $0x58] sm:$0xff]  ;;  %v1510_v63 = vld [vmem:[#allocation8 + $0xa8] sm:$0xf]  ;;  %s1206_s30 = scalar_lea.hbm %s2899_s5, %s1539_s11  ;;  %s2000_s21 = scalar_lea.hbm %s2899_s5, 384 }
  0x45   : > { %v1562_v10 = vld [vmem:[#allocation8 + $0x94] sm:$0xf]  ;;  %s1209_s19 = sshll.u32 %s1206_s30, 4  ;;  %s1210_s19 = int_to_ptr.hbm [resolvable:$true] %s1209_s19 }
  0x46   : > { %v1827_v11 = vpop.eup %1826  ;;  %s1994_s12 = sshra.s32 %s1210_s19, 4  ;;  %s1995_s12 = int_to_ptr.hbm [resolvable:$true] %s1994_s12 }
  0x47   : > { %v403_v12 = vmul.f32 128.0, %v1827_v11  ;;  %vm407_vm0 = vweird.f32 %v1827_v11  ;;  %s1996_s16 = scalar_lea.hbm %s1995_s12, 64  ;;  %p2001_p10 = scmp.lt.s32.totalorder %s1995_s12, %s2899_s5 }
  0x48   : > { %396 = vadd.xlane.f32.xlu1 %v365_v3  ;;  %376 = vadd.xlane.f32.xlu2 %v355_v5  ;;  %p1997_p1 = scmp.ne.s32.totalorder %s1995_s12, %s1996_s16  ;;  %p2002_p11 = scmp.lt.s32.totalorder %s2000_s21, %s1996_s16 }
  0x49   : > { %372 = vadd.xlane.f32.xlu0 %v353_v4  ;;  %v404_v13 = vsub.f32 1.0, %v403_v12  ;;  %v1500_v12 = vld [vmem:[#allocation8 + $0x9c] sm:$0xf0] }
  0x4a   : > { %p1998_p4 = pnand %p1997_p1, %p2248_p3  ;;  %p2003_p12 = por %p2002_p11, %p2001_p10 }
  0x4b   : > { %v405_v14 = vmul.f32 %v1827_v11, %v404_v13  ;;  %v1506_v13 = vld [vmem:[#allocation8 + $0x98] sm:$0xf] }
  0x4c   : > { %p1999_p8 = pneg %p1998_p4 }
  0x4d   : > { %v406_v15 = vadd.f32 %v1827_v11, %v405_v14  ;;  %v1564_v14 = vld [vmem:[#allocation8 + $0xa0] sm:$0xf0] }
  0x4e   : > { %p2004_p13 = pnand %p2003_p12, %p1999_p8 }
  0x4f   : > { %v2310_v16 = vsel %vm407_vm0, %v1827_v11, %v406_v15  ;;  %v2393_v15 = vor.u32 %v1562_v10, %v1500_v12  ;;  %v1438_v10 = vld [vmem:[#allocation8 + $0x18] sm:$0xf]  ;;  %v1547_v12 = vld [vmem:[#allocation8 + $0x1c] sm:$0xf] }
  0x50   : > { %400 = vadd.xlane.f32.xlu1 %v367_v7  ;;  %378 = vadd.xlane.f32.xlu2 %v356_v8 }
  0x51   : > { %398 = vadd.xlane.f32.xlu0 %v366_v6 }
  0x59   : > { %380 = vadd.xlane.f32.xlu0 %v2307_v9 }
  0xb3   : > { %v395_v17 = vpop.xlane.xlu1 %394  ;;  %v375_v23 = vpop.xlane.xlu2 %374 }
  0xb4   : > { %v371_v18 = vpop.xlane.xlu0 %370  ;;  %v421_v19 = vmul.f32 %v2310_v16, %v395_v17  ;;  %v411_v32 = vmul.f32 %v2310_v16, %v375_v23  ;;  %v2395_v17 = vor.u32 %v1564_v14, %v1506_v13 }
  0xb5   : > { %v409_v20 = vmul.f32 %v2310_v16, %v371_v18  ;;  %v1486_v18 = vld [vmem:[#allocation8 + $0x78] sm:$0xf] }
  0xb6   : > { %v2314_v21 = vsub.f32 %v364_v0, %v421_v19  ;;  %v2337_v37 = vsub.f32 %v354_v2, %v411_v32  ;;  %v1566_v0 = vld [vmem:[#allocation8 + $0xb0] sm:$0xf0]  ;;  %v1560_v19 = vld [vmem:[#allocation8 + $0x80] sm:$0xf0]  ;;  %v1557_v32 = vld [vmem:[#allocation8 + $0x68] sm:$0xf0] }
  0xb7   : > { %v2316_v22 = vsub.f32 %v352_v1, %v409_v20  ;;  %v1565_v1 = vld [vmem:[#allocation8 + $0xac] sm:$0xf]  ;;  %v1511_v2 = vor.u32 %v1566_v0, %v1510_v63  ;;  %v1559_v20 = vld [vmem:[#allocation8 + $0x7c] sm:$0xf]  ;;  %v1487_v23 = vor.u32 %v1560_v19, %v1486_v18  ;;  %v1550_v63 = vld [vmem:[#allocation8 + $0x34] sm:$0xf] }
  0xb8   : > { %v453_v24 = vmul.f32 %v2314_v21, %v2314_v21  ;;  %v443_v42 = vmul.f32 %v2337_v37, %v2337_v37  ;;  %v1440_v19 = vld [vmem:[#allocation8 + $0x24] sm:$0xf0] }
  0xb9   : > { %v441_v25 = vmul.f32 %v2316_v22, %v2316_v22  ;;  %911 = vmatpush.bf16.msra.mxu0 %v1511_v2  ;;  %1663 = vmatpush.bf16.msra.mxu3 %v1511_v2  ;;  %v1458_v2 = vld [vmem:[#allocation8 + $0x38] sm:$0xf] }
  0xba   : > { %481 = vadd.xlane.f32.xlu0 %v453_v24  ;;  %v1488_v24 = vld [vmem:[#allocation8 + $0x84] sm:$0xf0] }
  0xbb   : > { %457 = vadd.xlane.f32.xlu1 %v441_v25  ;;  %v397_v26 = vpop.xlane.xlu1 %396  ;;  %v377_v36 = vpop.xlane.xlu2 %376  ;;  %v1494_v25 = vld [vmem:[#allocation8 + $0x80] sm:$0xf] }
  0xbc   : > { %v373_v27 = vpop.xlane.xlu0 %372  ;;  %v422_v28 = vmul.f32 %v2310_v16, %v397_v26  ;;  %v412_v44 = vmul.f32 %v2310_v16, %v377_v36  ;;  %v1561_v26 = vld [vmem:[#allocation8 + $0x88] sm:$0xf0]  ;;  %v1476_v36 = vld [vmem:[#allocation8 + $0x6c] sm:$0xf0] }
  0xbd   : > { %v410_v29 = vmul.f32 %v2310_v16, %v373_v27  ;;  %v2399_v27 = vor.u32 %v1559_v20, %v1488_v24  ;;  %v1446_v20 = vld [vmem:[#allocation8 + $0x20] sm:$0xf]  ;;  %v2425_v24 = vor.u32 %v1547_v12, %v1440_v19 }
  0xbe   : > { %v2324_v30 = vsub.f32 %v365_v3, %v422_v28  ;;  %v2354_v48 = vsub.f32 %v355_v5, %v412_v44  ;;  %v1512_v3 = vld [vmem:[#allocation8 + $0xb4] sm:$0xf0]  ;;  %v1567_v5 = vld [vmem:[#allocation8 + $0xb8] sm:$0xf0]  ;;  %v2401_v28 = vor.u32 %v1561_v26, %v1494_v25  ;;  %v1554_v44 = vld [vmem:[#allocation8 + $0x50] sm:$0xf0] }
  0xbf   : > { %v2326_v31 = vsub.f32 %v353_v4, %v410_v29  ;;  %v1518_v4 = vld [vmem:[#allocation8 + $0xb0] sm:$0xf]  ;;  %v1474_v29 = vld [vmem:[#allocation8 + $0x60] sm:$0xf] }
  0xc0   : > { %v454_v34 = vmul.f32 %v2324_v30, %v2324_v30  ;;  %v444_v52 = vmul.f32 %v2354_v48, %v2354_v48 }
  0xc1   : > { %v442_v35 = vmul.f32 %v2326_v31, %v2326_v31 }
  0xc2   : > { %384 = vadd.xlane.f32.xlu0 %v2330_v33 }
  0xc3   : > { %483 = vadd.xlane.f32.xlu1 %v454_v34  ;;  %459 = vadd.xlane.f32.xlu2 %v442_v35  ;;  %v401_v39 = vpop.xlane.xlu1 %400  ;;  %v379_v49 = vpop.xlane.xlu2 %378  ;;  %v1556_v34 = vld [vmem:[#allocation8 + $0x64] sm:$0xf]  ;;  %v1475_v35 = vor.u32 %v1557_v32, %v1474_v29  ;;  %v1426_v32 = vld [vmem:[#allocation8] sm:$0xf] }
  0xc4   : > { %v399_v38 = vpop.xlane.xlu0 %398  ;;  %v424_v43 = vmul.f32 %v2310_v16, %v401_v39  ;;  %v413_v51 = vmul.f32 %v2310_v16, %v379_v49  ;;  %v1558_v39 = vld [vmem:[#allocation8 + $0x70] sm:$0xf0] }
  0xc5   : > { %v423_v40 = vmul.f32 %v2310_v16, %v399_v38  ;;  %v1482_v38 = vld [vmem:[#allocation8 + $0x68] sm:$0xf] }
  0xc6   : > { %v2351_v47 = vsub.f32 %v367_v7, %v424_v43  ;;  %v2365_v54 = vsub.f32 %v356_v8, %v413_v51  ;;  %v2389_v7 = vor.u32 %v1567_v5, %v1518_v4  ;;  %v1498_v8 = vld [vmem:[#allocation8 + $0x90] sm:$0xf]  ;;  %v1462_v43 = vld [vmem:[#allocation8 + $0x48] sm:$0xf] }
  0xc7   : > { %v2340_v41 = vsub.f32 %v366_v6, %v423_v40  ;;  %v2387_v6 = vor.u32 %v1565_v1, %v1512_v3  ;;  %v2405_v40 = vor.u32 %v1556_v34, %v1476_v36  ;;  %v1463_v49 = vor.u32 %v1554_v44, %v1462_v43  ;;  %v1470_v51 = vld [vmem:[#allocation8 + $0x50] sm:$0xf]  ;;  %v1452_v1 = vld [vmem:[#allocation8 + $0x3c] sm:$0xf0]  ;;  %v1552_v3 = vld [vmem:[#allocation8 + $0x40] sm:$0xf0] }
  0xc8   : > { %v456_v50 = vmul.f32 %v2351_v47, %v2351_v47  ;;  %v445_v56 = vmul.f32 %v2365_v54, %v2365_v54  ;;  %1009 = vmatpush.bf16.msra.mxu2 %v2389_v7  ;;  %v2417_v4 = vor.u32 %v1550_v63, %v1452_v1  ;;  %v2419_v5 = vor.u32 %v1552_v3, %v1458_v2  ;;  %v1545_v34 = vld [vmem:[#allocation8 + $0x8] sm:$0xf0]  ;;  %v1546_v43 = vld [vmem:[#allocation8 + $0x10] sm:$0xf0] }
  0xc9   : > { %v455_v46 = vmul.f32 %v2340_v41, %v2340_v41  ;;  %960 = vmatpush.bf16.msra.mxu1 %v2387_v6  ;;  %v1427_v36 = vor.u32 %v1545_v34, %v1426_v32 }
  0xcb   : > { %461 = vadd.xlane.f32.xlu1 %v443_v42  ;;  %485 = vadd.xlane.f32.xlu0 %v455_v46  ;;  %v2407_v42 = vor.u32 %v1558_v39, %v1482_v38  ;;  %v1553_v46 = vld [vmem:[#allocation8 + $0x4c] sm:$0xf]  ;;  %v1428_v38 = vld [vmem:[#allocation8 + $0xc] sm:$0xf0]  ;;  %v1434_v39 = vld [vmem:[#allocation8 + $0x8] sm:$0xf] }
  0xcc   : > { %382 = vadd.xlane.f32.xlu2 %v2347_v45  ;;  %v381_v55 = vpop.xlane.xlu0 %380  ;;  %1010 = vmatpush.bf16.msra.mxu2 %v2395_v17 }
  0xcd   : > { %v414_v58 = vmul.f32 %v2310_v16, %v381_v55  ;;  %961 = vmatpush.bf16.msra.mxu1 %v2393_v15 }
  0xcf   : > { %v2379_v60 = vsub.f32 %v2307_v9, %v414_v58  ;;  %v1563_v9 = vld [vmem:[#allocation8 + $0x98] sm:$0xf0]  ;;  %v1450_v58 = vld [vmem:[#allocation8 + $0x30] sm:$0xf] }
  0xd0   : > { %v1499_v11 = vor.u32 %v1563_v9, %v1498_v8  ;;  %1011 = vmatpush.bf16.msra.mxu2 %v2401_v28 }
  0xd1   : > { %v446_v62 = vmul.f32 %v2379_v60, %v2379_v60  ;;  %962 = vmatpush.bf16.msra.mxu1 %v2399_v27 }
  0xd2   : > { %912 = vmatpush.bf16.msra.mxu0 %v1499_v11  ;;  %1664 = vmatpush.bf16.msra.mxu3 %v1499_v11  ;;  %v1548_v11 = vld [vmem:[#allocation8 + $0x20] sm:$0xf0] }
  0xd3   : > { %487 = vadd.xlane.f32.xlu1 %v456_v50  ;;  %388 = vadd.xlane.f32.xlu0 %v2362_v53  ;;  %v1464_v50 = vld [vmem:[#allocation8 + $0x54] sm:$0xf0]  ;;  %v1439_v18 = vor.u32 %v1548_v11, %v1438_v10 }
  0xd4   : > { %463 = vadd.xlane.f32.xlu2 %v444_v52  ;;  %1012 = vmatpush.bf16.msra.mxu2 %v2407_v42  ;;  %v1555_v52 = vld [vmem:[#allocation8 + $0x58] sm:$0xf0]  ;;  %v2411_v55 = vor.u32 %v1553_v46, %v1464_v50  ;;  %v2439_v46 = vor.u32 %v1546_v43, %v1434_v39 }
  0xd5   : > { %963 = vmatpush.bf16.msra.mxu1 %v2405_v40 }
  0xd6   : > { %913 = vmatpush.bf16.msra.mxu0 %v1487_v23  ;;  %1665 = vmatpush.bf16.msra.mxu3 %v1487_v23  ;;  %v1549_v23 = vld [vmem:[#allocation8 + $0x28] sm:$0xf0] }
  0xd7   : > { %v2427_v25 = vor.u32 %v1549_v23, %v1446_v20 }
  0xd9   : > { %964 = vmatpush.bf16.msra.mxu1 %v2411_v55 }
  0xda   : > { %914 = vmatpush.bf16.msra.mxu0 %v1475_v35  ;;  %1666 = vmatpush.bf16.msra.mxu3 %v1475_v35  ;;  %v1544_v35 = vld [vmem:[#allocation8 + $0x4] sm:$0xf] }
  0xdb   : > { %465 = vadd.xlane.f32.xlu1 %v445_v56  ;;  %390 = vadd.xlane.f32.xlu0 %v2370_v57  ;;  %v2413_v56 = vor.u32 %v1555_v52, %v1470_v51  ;;  %v2437_v44 = vor.u32 %v1544_v35, %v1428_v38 }
  0xdc   : > { %386 = vadd.xlane.f32.xlu2 %v2374_v59 }
  0xdd   : > { %1013 = vmatpush.bf16.msra.mxu2 %v2413_v56  ;;  %965 = vmatpush.bf16.msra.mxu1 %v2417_v4 }
  0xde   : > { %915 = vmatpush.bf16.msra.mxu0 %v1463_v49  ;;  %1667 = vmatpush.bf16.msra.mxu3 %v1463_v49 }
  0xe1   : > { %1014 = vmatpush.bf16.msra.mxu2 %v2419_v5  ;;  %966 = vmatpush.bf16.msra.mxu1 %v2425_v24 }
  0xe3   : > { %392 = vadd.xlane.f32.xlu1 %v2382_v61 }
  0xe4   : > { %467 = vadd.xlane.f32.xlu2 %v446_v62  ;;  %v1551_v62 = vld [vmem:[#allocation8 + $0x38] sm:$0xf0] }
  0xe5   : > { %v1451_v0 = vor.u32 %v1551_v62, %v1450_v58  ;;  %1015 = vmatpush.bf16.msra.mxu2 %v2427_v25  ;;  %967 = vmatpush.bf16.msra.mxu1 %v2437_v44 }
  0xe7   : > { %916 = vmatpush.bf16.msra.mxu0 %v1451_v0  ;;  %1668 = vmatpush.bf16.msra.mxu3 %v1451_v0 }
  0xe9   : > { %1016 = vmatpush.bf16.msra.mxu2 %v2439_v46 }
  0xeb   : > { %917 = vmatpush.bf16.msra.mxu0 %v1439_v18  ;;  %1669 = vmatpush.bf16.msra.mxu3 %v1439_v18 }
  0xef   : > { %918 = vmatpush.bf16.msra.mxu0 %v1427_v36  ;;  %1670 = vmatpush.bf16.msra.mxu3 %v1427_v36 }
  0xf3   : > { %1671 = vmatpush.bf16.msrb.mxu3 %v2387_v6 }
  0xf7   : > { %1672 = vmatpush.bf16.msrb.mxu3 %v2393_v15 }
  0xfb   : > { %1673 = vmatpush.bf16.msrb.mxu3 %v2399_v27 }
  0xff   : > { %1674 = vmatpush.bf16.msrb.mxu3 %v2405_v40 }
 0x103   : > { %1675 = vmatpush.bf16.msrb.mxu3 %v2411_v55 }
 0x107   : > { %1676 = vmatpush.bf16.msrb.mxu3 %v2417_v4 }
 0x10b   : > { %1677 = vmatpush.bf16.msrb.mxu3 %v2425_v24 }
 0x10f   : > { %1678 = vmatpush.bf16.msrb.mxu3 %v2437_v44 }
 0x12d   : > { %v482_v9 = vpop.xlane.xlu0 %481 }
 0x12e   : > { %v458_v8 = vpop.xlane.xlu1 %457  ;;  %v501_v14 = vmul.f32 %v482_v9, %v2310_v16 }
 0x12f   : > { %v489_v13 = vmul.f32 %v458_v8, %v2310_v16 }
 0x130   : > { %v2431_v29 = vadd.f32 1e-05, %v501_v14 }
 0x131   : > { %v2429_v26 = vadd.f32 1e-05, %v489_v13 }
 0x132   : > { %vm647_vm4 = vweird.f32 %v2431_v29 }
 0x133   : > { %1828 = vrsqrt.f32 %v2429_v26  ;;  %vm527_vm2 = vweird.f32 %v2429_v26 }
 0x134   : > { %1830 = vrsqrt.f32 %v2431_v29 }
 0x135   : > { %v385_v50 = vpop.xlane.xlu0 %384 }
 0x136   : > { %v484_v49 = vpop.xlane.xlu1 %483  ;;  %v460_v52 = vpop.xlane.xlu2 %459  ;;  %v416_v58 = vmul.f32 %v2310_v16, %v385_v50 }
 0x137   : > { %v502_v51 = vmul.f32 %v484_v49, %v2310_v16  ;;  %v490_v62 = vmul.f32 %v460_v52, %v2310_v16 }
 0x138   : > { %v2452_v1 = vsub.f32 %v2330_v33, %v416_v58 }
 0x139   : > { %v2447_v63 = vpop.eup %1828  ;;  %v2449_v0 = vadd.f32 1e-05, %v502_v51  ;;  %v2458_v8 = vadd.f32 1e-05, %v490_v62 }
 0x13a   : > { %v2454_v2 = vpop.eup %1830  ;;  %v522_v3 = vmul.f32 %v2447_v63, %v2429_v26  ;;  %v448_v33 = vmul.f32 %v2452_v1, %v2452_v1  ;;  %vm528_vm1 = vweird.f32 %v2447_v63 }
 0x13b   : > { %v642_v9 = vmul.f32 %v2454_v2, %v2431_v29  ;;  %1832 = vrsqrt.f32 %v2449_v0  ;;  %vm2488_vm3 = vmor %vm527_vm2, %vm528_vm1  ;;  %vm648_vm5 = vweird.f32 %v2454_v2  ;;  %vm657_vm6 = vweird.f32 %v2449_v0 }
 0x13c   : > { %v523_v6 = vmul.f32 %v2447_v63, %v522_v3  ;;  %1834 = vrsqrt.f32 %v2458_v8  ;;  %471 = vadd.xlane.f32.xlu0 %v448_v33  ;;  %vm2504_vm7 = vmor %vm647_vm4, %vm648_vm5  ;;  %vm537_vm11 = vweird.f32 %v2458_v8 }
 0x13d   : > { %v643_v10 = vmul.f32 %v2454_v2, %v642_v9 }
 0x13e   : > { %v524_v11 = vmul.f32 0.5, %v523_v6  ;;  %v462_v12 = vpop.xlane.xlu1 %461  ;;  %v486_v13 = vpop.xlane.xlu0 %485 }
 0x13f   : > { %v644_v14 = vmul.f32 0.5, %v643_v10  ;;  %v491_v18 = vmul.f32 %v462_v12, %v2310_v16  ;;  %v383_v19 = vpop.xlane.xlu2 %382  ;;  %v503_v20 = vmul.f32 %v486_v13, %v2310_v16 }
 0x140   : > { %v525_v15 = vsub.f32 1.5, %v524_v11  ;;  %v415_v23 = vmul.f32 %v2310_v16, %v383_v19  ;;  %v2517_v19 = vld [vmem:[#allocation5] ss:$0 sm:$0xff] }
 0x141   : > { %v1833_v32 = vpop.eup %1832  ;;  %v645_v34 = vsub.f32 1.5, %v644_v14  ;;  %v2473_v35 = vadd.f32 1e-05, %v491_v18  ;;  %v2475_v36 = vadd.f32 1e-05, %v503_v20 }
 0x142   : > { %v1835_v38 = vpop.eup %1834  ;;  %v526_v39 = vmul.f32 %v2447_v63, %v525_v15  ;;  %v652_v43 = vmul.f32 %v1833_v32, %v2449_v0  ;;  %v2481_v49 = vsub.f32 %v2347_v45, %v415_v23  ;;  %vm658_vm8 = vweird.f32 %v1833_v32 }
 0x143   : > { %v532_v27 = vmul.f32 %v1835_v38, %v2458_v8  ;;  %1836 = vrsqrt.f32 %v2473_v35  ;;  %v646_v52 = vmul.f32 %v2454_v2, %v645_v34  ;;  %vm538_vm9 = vweird.f32 %v1835_v38  ;;  %vm659_vm10 = vmor %vm657_vm6, %vm658_vm8 }
 0x144   : > { %v653_v50 = vmul.f32 %v1833_v32, %v652_v43  ;;  %1838 = vrsqrt.f32 %v2475_v36  ;;  %v530_v40 = vsel %vm2488_vm3, %v2447_v63, %v526_v39  ;;  %v447_v26 = vmul.f32 %v2481_v49, %v2481_v49  ;;  %vm539_vm12 = vmor %vm537_vm11, %vm538_vm9 }
 0x145   : > { %v533_v45 = vmul.f32 %v1835_v38, %v532_v27  ;;  %v681_v13 = vmul.f32 %v530_v40, %v2316_v22  ;;  %v650_v14 = vsel %vm2504_vm7, %v2454_v2, %v646_v52  ;;  %v2543_v52 = vld [vmem:[#allocation7] ss:$0 sm:$0xff]  ;;  %vm667_vm13 = vweird.f32 %v2475_v36 }
 0x146   : > { %v654_v58 = vmul.f32 0.5, %v653_v50  ;;  %v488_v62 = vpop.xlane.xlu1 %487  ;;  %v389_v3 = vpop.xlane.xlu0 %388  ;;  %469 = vadd.xlane.f32.xlu2 %v447_v26  ;;  %v693_v43 = vmul.f32 %v650_v14, %v2314_v21  ;;  %vm547_vm0 = vweird.f32 %v2473_v35 }
 0x147   : > { %v534_v9 = vmul.f32 0.5, %v533_v45  ;;  %v504_v6 = vmul.f32 %v488_v62, %v2310_v16  ;;  %v464_v33 = vpop.xlane.xlu2 %463  ;;  %v418_v29 = vmul.f32 %v2310_v16, %v389_v3  ;;  %v700_v51 = vmul.f32 %v2517_v19, %v681_v13 }
 0x148   : > { %v655_v63 = vsub.f32 1.5, %v654_v58  ;;  %v492_v11 = vmul.f32 %v464_v33, %v2310_v16 }
 0x149   : > { %v2509_v12 = vpop.eup %1836  ;;  %v535_v18 = vsub.f32 1.5, %v534_v9  ;;  %v2515_v55 = vadd.f32 1e-05, %v504_v6  ;;  %v2526_v39 = vsub.f32 %v2362_v53, %v418_v29  ;;  %v712_v6 = vmul.f32 %v2517_v19, %v693_v43 }
 0x14a   : > { %v2519_v20 = vpop.eup %1838  ;;  %v656_v15 = vmul.f32 %v1833_v32, %v655_v63  ;;  %v542_v23 = vmul.f32 %v2509_v12, %v2473_v35  ;;  %v2523_v34 = vadd.f32 1e-05, %v492_v11  ;;  %vm548_vm14 = vweird.f32 %v2509_v12 }
 0x14b   : > { %v536_v22 = vmul.f32 %v1835_v38, %v535_v18  ;;  %v662_v2 = vmul.f32 %v2519_v20, %v2475_v36  ;;  %1840 = vrsqrt.f32 %v2515_v55  ;;  %v450_v21 = vmul.f32 %v2526_v39, %v2526_v39  ;;  %vm2585_vm1 = vmor %vm547_vm0, %vm548_vm14 }
 0x14c   : > { %v660_v27 = vsel %vm659_vm10, %v1833_v32, %v656_v15  ;;  %v543_v53 = vmul.f32 %v2509_v12, %v542_v23  ;;  %1842 = vrsqrt.f32 %v2523_v34  ;;  %v719_v63 = vadd.f32 %v2543_v52, %v700_v51 }
 0x14d   : > { %v694_v0 = vmul.f32 %v660_v27, %v2324_v30  ;;  %v540_v50 = vsel %vm539_vm12, %v1835_v38, %v536_v22  ;;  %v663_v8 = vmul.f32 %v2519_v20, %v662_v2  ;;  %vm668_vm15 = vweird.f32 %v2519_v20 }
 0x14e   : > { %v682_v4 = vmul.f32 %v540_v50, %v2326_v31  ;;  %v544_v45 = vmul.f32 0.5, %v543_v53  ;;  %v466_v32 = vpop.xlane.xlu1 %465  ;;  %v391_v40 = vpop.xlane.xlu0 %390  ;;  %475 = vadd.xlane.f32.xlu2 %v450_v21  ;;  %v731_v43 = vadd.f32 %v2543_v52, %v712_v6  ;;  %vm677_vm2 = vweird.f32 %v2515_v55  ;;  %vm2599_vm3 = vmor %vm667_vm13, %vm668_vm15 }
 0x14f   : > { %v664_v58 = vmul.f32 0.5, %v663_v8  ;;  %v493_v30 = vmul.f32 %v466_v32, %v2310_v16  ;;  %v387_v38 = vpop.xlane.xlu2 %386  ;;  %v419_v26 = vmul.f32 %v2310_v16, %v391_v40  ;;  %v713_v62 = vmul.f32 %v2517_v19, %v694_v0 }
 0x150   : > { %v545_v3 = vsub.f32 1.5, %v544_v45  ;;  %v417_v31 = vmul.f32 %v2310_v16, %v387_v38  ;;  %v701_v9 = vmul.f32 %v2517_v19, %v682_v4  ;;  %vm557_vm7 = vweird.f32 %v2523_v34 }
 0x151   : > { %v2556_v33 = vpop.eup %1840  ;;  %v665_v29 = vsub.f32 1.5, %v664_v58  ;;  %v2559_v10 = vadd.f32 1e-05, %v493_v30  ;;  %v732_v14 = vadd.f32 %v2543_v52, %v713_v62  ;;  %v2573_v23 = vsub.f32 %v2370_v57, %v419_v26 }
 0x152   : > { %v1843_v11 = vpop.eup %1842  ;;  %v672_v24 = vmul.f32 %v2556_v33, %v2515_v55  ;;  %v2566_v13 = vsub.f32 %v2374_v59, %v417_v31  ;;  %v546_v18 = vmul.f32 %v2509_v12, %v545_v3  ;;  %v720_v59 = vadd.f32 %v2543_v52, %v701_v9 }
 0x153   : > { %v552_v15 = vmul.f32 %v1843_v11, %v2523_v34  ;;  %1844 = vrsqrt.f32 %v2559_v10  ;;  %v666_v22 = vmul.f32 %v2519_v20, %v665_v29  ;;  %v2590_v50 = vpack.c.bf16 %v732_v14, %v731_v43 }
 0x154   : > { %v673_v2 = vmul.f32 %v2556_v33, %v672_v24  ;;  %v449_v53 = vmul.f32 %v2566_v13, %v2566_v13  ;;  %v735_v0 = vpack.c.bf16 %v720_v59, %v719_v63  ;;  %v550_v35 = vsel %vm2585_vm1, %v2509_v12, %v546_v18 }
 0x155   : > { %v553_v27 = vmul.f32 %v1843_v11, %v552_v15  ;;  %v451_v45 = vmul.f32 %v2573_v23, %v2573_v23  ;;  %v670_v12 = vsel %vm2599_vm3, %v2519_v20, %v666_v22  ;;  %vm678_vm4 = vweird.f32 %v2556_v33  ;;  %949 = vmatmul.bf16.vlgmr.msra.gmra.mxu3 %v2590_v50 }
 0x156   : > { %v674_v44 = vmul.f32 0.5, %v673_v2  ;;  %v393_v8 = vpop.xlane.xlu1 %392  ;;  %473 = vadd.xlane.f32.xlu1 %v449_v53  ;;  %919 = vmatmul.bf16.vlgmr.msra.gmra.mxu0 %v735_v0  ;;  %vm558_vm5 = vweird.f32 %v1843_v11  ;;  %v683_v26 = vmul.f32 %v550_v35, %v2337_v37  ;;  %v695_v31 = vmul.f32 %v670_v12, %v2340_v41  ;;  %vm679_vm6 = vmor %vm677_vm2, %vm678_vm4 }
 0x157   : > { %v554_v4 = vmul.f32 0.5, %v553_v27  ;;  %v420_v21 = vmul.f32 %v2310_v16, %v393_v8  ;;  %v468_v32 = vpop.xlane.xlu2 %467  ;;  %968 = vmatmul.bf16.vlgmr.msra.gmra.mxu1 %v735_v0  ;;  %1017 = vmatmul.bf16.vlgmr.msra.gmra.mxu2 %v735_v0  ;;  %vm559_vm8 = vmor %vm557_vm7, %vm558_vm5  ;;  %vm567_vm9 = vweird.f32 %v2559_v10 }
 0x158   : > { %v675_v40 = vsub.f32 1.5, %v674_v44  ;;  %v494_v36 = vmul.f32 %v468_v32, %v2310_v16  ;;  %477 = vadd.xlane.f32.xlu0 %v451_v45  ;;  %1679 = vmatpush.bf16.msra.mxu3 %v2389_v7  ;;  %v702_v55 = vmul.f32 %v2517_v19, %v683_v26  ;;  %v714_v34 = vmul.f32 %v2517_v19, %v695_v31 }
 0x159   : > { %v1845_v58 = vpop.eup %1844  ;;  %v555_v30 = vsub.f32 1.5, %v554_v4  ;;  %v2613_v38 = vsub.f32 %v2382_v61, %v420_v21 }
 0x15a   : > { %v676_v20 = vmul.f32 %v2556_v33, %v675_v40  ;;  %v562_v62 = vmul.f32 %v1845_v58, %v2559_v10  ;;  %v510_v3 = vadd.f32 1e-05, %v494_v36  ;;  %vm568_vm10 = vweird.f32 %v1845_v58 }
 0x15b   : > { %v556_v9 = vmul.f32 %v1843_v11, %v555_v30  ;;  %v452_v37 = vmul.f32 %v2613_v38, %v2613_v38  ;;  %v733_v22 = vadd.f32 %v2543_v52, %v714_v34  ;;  %vm569_vm11 = vmor %vm567_vm9, %vm568_vm10 }
 0x15c   : > { %v680_v61 = vsel %vm679_vm6, %v2556_v33, %v676_v20  ;;  %v563_v6 = vmul.f32 %v1845_v58, %v562_v62  ;;  %1846 = vrsqrt.f32 %v510_v3  ;;  %1680 = vmatpush.bf16.msra.mxu3 %v2395_v17  ;;  %vm577_vm12 = vweird.f32 %v510_v3 }
 0x15d   : > { %v696_v7 = vmul.f32 %v680_v61, %v2351_v47  ;;  %v560_v41 = vsel %vm559_vm8, %v1843_v11, %v556_v9  ;;  %v721_v47 = vadd.f32 %v2543_v52, %v702_v55 }
 0x15e   : > { %v684_v29 = vmul.f32 %v560_v41, %v2354_v48  ;;  %v564_v63 = vmul.f32 0.5, %v563_v6  ;;  %479 = vadd.xlane.f32.xlu1 %v452_v37 }
 0x15f   : > { %v715_v24 = vmul.f32 %v2517_v19, %v696_v7 }
 0x160   : > { %v565_v33 = vsub.f32 1.5, %v564_v63  ;;  %v703_v14 = vmul.f32 %v2517_v19, %v684_v29  ;;  %1681 = vmatpush.bf16.msra.mxu3 %v2401_v28 }
 0x161   : > { %v734_v18 = vadd.f32 %v2543_v52, %v715_v24  ;;  %v775_v24 = vld [vmem:[%s2898_s4] sm:$0x7] }
 0x162   : > { %v1847_v15 = vpop.eup %1846  ;;  %v722_v48 = vadd.f32 %v2543_v52, %v703_v14  ;;  %v566_v17 = vmul.f32 %v1845_v58, %v565_v33 }
 0x163   : > { %v572_v11 = vmul.f32 %v1847_v15, %v510_v3  ;;  %v742_v43 = vpack.c.bf16 %v734_v18, %v733_v22  ;;  %vm578_vm13 = vweird.f32 %v1847_v15 }
 0x164   : > { %v736_v2 = vpack.c.bf16 %v722_v48, %v721_v47  ;;  %1682 = vmatpush.bf16.msra.mxu3 %v2407_v42  ;;  %v570_v27 = vsel %vm569_vm11, %v1845_v58, %v566_v17  ;;  %vm579_vm14 = vmor %vm577_vm12, %vm578_vm13  ;;  %v2671_v48 = vperm.slane %v775_v24, 0 }
 0x165   : > { %v573_v59 = vmul.f32 %v1847_v15, %v572_v11  ;;  %954 = vmatmul.bf16.gmra.mxu3 %v742_v43  ;;  %v685_v28 = vmul.f32 %v570_v27, %v2365_v54 }
 0x166   : > { %924 = vmatmul.bf16.gmra.mxu0 %v736_v2 }
 0x167   : > { %v574_v53 = vmul.f32 0.5, %v573_v59  ;;  %973 = vmatmul.bf16.gmra.mxu1 %v736_v2  ;;  %1022 = vmatmul.bf16.gmra.mxu2 %v736_v2  ;;  %v704_v42 = vmul.f32 %v2517_v19, %v685_v28 }
 0x168   : > { %1683 = vmatpush.bf16.msra.mxu3 %v2413_v56 }
 0x169   : > { %v575_v10 = vsub.f32 1.5, %v574_v53  ;;  %v723_v35 = vadd.f32 %v2543_v52, %v704_v42 }
 0x16b   : > { %v576_v57 = vmul.f32 %v1847_v15, %v575_v10 }
 0x16c   : > { %1684 = vmatpush.bf16.msra.mxu3 %v2419_v5 }
 0x16d   : > { %v580_v44 = vsel %vm579_vm14, %v1847_v15, %v576_v57 }
 0x16e   : > { %v686_v0 = vmul.f32 %v580_v44, %v2379_v60 }
 0x170   : > { %v705_v8 = vmul.f32 %v2517_v19, %v686_v0  ;;  %1685 = vmatpush.bf16.msra.mxu3 %v2427_v25 }
 0x172   : > { %v724_v51 = vadd.f32 %v2543_v52, %v705_v8 }
 0x174   : > { %v737_v54 = vpack.c.bf16 %v724_v51, %v723_v35  ;;  %1686 = vmatpush.bf16.msra.mxu3 %v2439_v46 }
 0x175   : > { %998 = vmatmul.bf16.vlgmr.msrb.gmra.mxu3 %v2590_v50 }
 0x176   : > { %929 = vmatmul.bf16.gmra.mxu0 %v737_v54 }
 0x177   : > { %978 = vmatmul.bf16.gmra.mxu1 %v737_v54  ;;  %1027 = vmatmul.bf16.gmra.mxu2 %v737_v54 }
 0x185   : > { %1003 = vmatmul.bf16.gmra.mxu3 %v742_v43 }
 0x195   : > { %1047 = vmatmul.bf16.vlgmr.msra.gmra.mxu3 %v2590_v50 }
 0x1a5   : > { %1052 = vmatmul.bf16.gmra.mxu3 %v742_v43 }
 0x1af   : > { %v472_v60 = vpop.xlane.xlu0 %471 }
 0x1b0   : > { %v496_v56 = vmul.f32 %v472_v60, %v2310_v16 }
 0x1b2   : > { %v512_v5 = vadd.f32 1e-05, %v496_v56 }
 0x1b4   : > { %1848 = vrsqrt.f32 %v512_v5  ;;  %vm597_vm15 = vweird.f32 %v512_v5 }
 0x1b9   : > { %v470_v4 = vpop.xlane.xlu2 %469 }
 0x1ba   : > { %v1849_v45 = vpop.eup %1848  ;;  %v495_v25 = vmul.f32 %v470_v4, %v2310_v16 }
 0x1bb   : > { %v592_v21 = vmul.f32 %v1849_v45, %v512_v5  ;;  %vm598_vm0 = vweird.f32 %v1849_v45 }
 0x1bc   : > { %v511_v46 = vadd.f32 1e-05, %v495_v25  ;;  %vm599_vm1 = vmor %vm597_vm15, %vm598_vm0 }
 0x1bd   : > { %v593_v32 = vmul.f32 %v1849_v45, %v592_v21 }
 0x1be   : > { %1850 = vrsqrt.f32 %v511_v46  ;;  %vm587_vm3 = vweird.f32 %v511_v46 }
 0x1bf   : > { %v594_v12 = vmul.f32 0.5, %v593_v32 }
 0x1c1   : > { %v476_v40 = vpop.xlane.xlu2 %475  ;;  %v595_v36 = vsub.f32 1.5, %v594_v12 }
 0x1c2   : > { %v498_v58 = vmul.f32 %v476_v40, %v2310_v16 }
 0x1c3   : > { %v596_v20 = vmul.f32 %v1849_v45, %v595_v36 }
 0x1c4   : > { %v1851_v50 = vpop.eup %1850  ;;  %v514_v30 = vadd.f32 1e-05, %v498_v58 }
 0x1c5   : > { %v582_v26 = vmul.f32 %v1851_v50, %v511_v46  ;;  %v600_v37 = vsel %vm599_vm1, %v1849_v45, %v596_v20  ;;  %vm588_vm2 = vweird.f32 %v1851_v50 }
 0x1c6   : > { %1852 = vrsqrt.f32 %v514_v30  ;;  %v688_v63 = vmul.f32 %v600_v37, %v2452_v1  ;;  %vm589_vm4 = vmor %vm587_vm3, %vm588_vm2  ;;  %v2673_v1 = vperm.slane %v775_v24, 1  ;;  %vm617_vm5 = vweird.f32 %v514_v30 }
 0x1c7   : > { %v583_v62 = vmul.f32 %v1851_v50, %v582_v26  ;;  %v2709_v26 = vperm.slane %v775_v24, 2 }
 0x1c8   : > { %v707_v22 = vmul.f32 %v2517_v19, %v688_v63 }
 0x1c9   : > { %v474_v3 = vpop.xlane.xlu1 %473  ;;  %v584_v31 = vmul.f32 0.5, %v583_v62 }
 0x1ca   : > { %v497_v9 = vmul.f32 %v474_v3, %v2310_v16  ;;  %v726_v0 = vadd.f32 %v2543_v52, %v707_v22 }
 0x1cb   : > { %v585_v61 = vsub.f32 1.5, %v584_v31  ;;  %v478_v7 = vpop.xlane.xlu0 %477 }
 0x1cc   : > { %v2659_v6 = vadd.f32 1e-05, %v497_v9  ;;  %v1853_v41 = vpop.eup %1852  ;;  %v499_v29 = vmul.f32 %v478_v7, %v2310_v16 }
 0x1cd   : > { %v586_v55 = vmul.f32 %v1851_v50, %v585_v61  ;;  %v612_v34 = vmul.f32 %v1853_v41, %v514_v30  ;;  %vm618_vm6 = vweird.f32 %v1853_v41 }
 0x1ce   : > { %1854 = vrsqrt.f32 %v2659_v6  ;;  %v2667_v33 = vadd.f32 1e-05, %v499_v29  ;;  %vm2689_vm7 = vmor %vm617_vm5, %vm618_vm6  ;;  %vm607_vm9 = vweird.f32 %v2659_v6 }
 0x1cf   : > { %v590_v14 = vsel %vm589_vm4, %v1851_v50, %v586_v55  ;;  %v613_v18 = vmul.f32 %v1853_v41, %v612_v34 }
 0x1d0   : > { %v687_v15 = vmul.f32 %v590_v14, %v2481_v49  ;;  %1856 = vrsqrt.f32 %v2667_v33  ;;  %vm627_vm11 = vweird.f32 %v2667_v33 }
 0x1d1   : > { %v480_v47 = vpop.xlane.xlu1 %479  ;;  %v614_v17 = vmul.f32 0.5, %v613_v18 }
 0x1d2   : > { %v500_v11 = vmul.f32 %v480_v47, %v2310_v16  ;;  %v706_v2 = vmul.f32 %v2517_v19, %v687_v15 }
 0x1d3   : > { %v615_v43 = vsub.f32 1.5, %v614_v17  ;;  %v920_v49 = vpop.f32.mrf.mxu0 }
 0x1d4   : > { %v1855_v59 = vpop.eup %1854  ;;  %v2678_v27 = vadd.f32 1e-05, %v500_v11  ;;  %v969_v53 = vpop.f32.mrf.mxu1  ;;  %v921_v28 = vadd.f32 %v920_v49, %v2671_v48  ;;  %v725_v16 = vadd.f32 %v2543_v52, %v706_v2 }
 0x1d5   : > { %v602_v10 = vmul.f32 %v1855_v59, %v2659_v6  ;;  %v970_v57 = vadd.f32 %v969_v53, %v2673_v1  ;;  %v616_v44 = vmul.f32 %v1853_v41, %v615_v43  ;;  %vm608_vm8 = vweird.f32 %v1855_v59 }
 0x1d6   : > { %1858 = vrsqrt.f32 %v2678_v27  ;;  %v2686_v42 = vpop.eup %1856  ;;  %v738_v60 = vpack.c.bf16 %v726_v0, %v725_v16  ;;  %vm609_vm10 = vmor %vm607_vm9, %vm608_vm8  ;;  %vm637_vm13 = vweird.f32 %v2678_v27 }
 0x1d7   : > { %v603_v8 = vmul.f32 %v1855_v59, %v602_v10  ;;  %v1058_v35 = vpack.c.bf16 %v970_v57, %v921_v28  ;;  %v622_v54 = vmul.f32 %v2686_v42, %v2667_v33  ;;  %v620_v56 = vsel %vm2689_vm7, %v1853_v41, %v616_v44 }
 0x1d8   : > { %934 = vmatmul.bf16.gmra.mxu0 %v738_v60  ;;  %983 = vmatmul.bf16.gmra.mxu1 %v738_v60  ;;  %v950_v21 = vpop.f32.mrf.mxu3  ;;  %v690_v12 = vmul.f32 %v620_v56, %v2526_v39  ;;  %vm628_vm12 = vweird.f32 %v2686_v42 }
 0x1d9   : > { %v604_v5 = vmul.f32 0.5, %v603_v8  ;;  %v1122_v4 = vrot.slane %v1058_v35, 4  ;;  %v623_v25 = vmul.f32 %v2686_v42, %v622_v54  ;;  %1032 = vmatmul.bf16.gmra.mxu2 %v738_v60  ;;  %v2722_v63 = vadd.f32 %v950_v21, %v2671_v48  ;;  %vm2741_vm15 = vmor %vm627_vm11, %vm628_vm12 }
 0x1da   : > { %v1018_v46 = vpop.f32.mrf.mxu2  ;;  %v709_v61 = vmul.f32 %v2517_v19, %v690_v12 }
 0x1db   : > { %v605_v45 = vsub.f32 1.5, %v604_v5  ;;  %1154 = vst [vmem:[%s2700_s26] sm:$0xf] %v1122_v4  ;;  %v922_v40 = vpop.f32.mrf.mxu0  ;;  %v624_v3 = vmul.f32 0.5, %v623_v25  ;;  %v1019_v55 = vadd.f32 %v1018_v46, %v2709_v26 }
 0x1dc   : > { %v1859_v32 = vpop.eup %1858  ;;  %v971_v36 = vpop.f32.mrf.mxu1  ;;  %v923_v30 = vadd.f32 %v922_v40, %v2671_v48  ;;  %v728_v11 = vadd.f32 %v2543_v52, %v709_v61 }
 0x1dd   : > { %v606_v58 = vmul.f32 %v1855_v59, %v605_v45  ;;  %v632_v50 = vmul.f32 %v1859_v32, %v2678_v27  ;;  %v972_v20 = vadd.f32 %v971_v36, %v2673_v1  ;;  %v625_v29 = vsub.f32 1.5, %v624_v3 }
 0x1de   : > { %v1571_v9 = vpack.c.bf16 %v923_v30, %v921_v28  ;;  %vm638_vm14 = vweird.f32 %v1859_v32 }
 0x1df   : > { %v610_v62 = vsel %vm609_vm10, %v1855_v59, %v606_v58  ;;  %v633_v31 = vmul.f32 %v1859_v32, %v632_v50  ;;  %v1060_v37 = vpack.c.bf16 %v972_v20, %v923_v30  ;;  %v626_v10 = vmul.f32 %v2686_v42, %v625_v29  ;;  %vm639_vm0 = vmor %vm637_vm13, %vm638_vm14 }
 0x1e0   : > { %v689_v39 = vmul.f32 %v610_v62, %v2566_v13  ;;  %1572 = vst [vmem:[%s2715_s9] sm:$0xff] %v1571_v9   ;;  %v952_v34 = vpop.f32.mrf.mxu3 }
 0x1e1   : > { %v634_v6 = vmul.f32 0.5, %v633_v31  ;;  %v1123_v7 = vrot.slane %v1060_v37, 4  ;;  %v2727_v14 = vadd.f32 %v952_v34, %v2671_v48  ;;  %v630_v0 = vsel %vm2741_vm15, %v2686_v42, %v626_v10 }
 0x1e2   : > { %v708_v41 = vmul.f32 %v2517_v19, %v689_v39  ;;  %v1020_v24 = vpop.f32.mrf.mxu2  ;;  %v691_v56 = vmul.f32 %v630_v0, %v2573_v23 }
 0x1e3   : > { %v635_v13 = vsub.f32 1.5, %v634_v6  ;;  %1155 = vst [vmem:[%s2700_s26 + $0x4] sm:$0xf] %v1123_v7  ;;  %v1021_v18 = vadd.f32 %v1020_v24, %v2709_v26  ;;  %v925_v15 = vpop.f32.mrf.mxu0  ;;  %v1601_v43 = vpack.c.bf16 %v2727_v14, %v2722_v63 }
 0x1e4   : > { %v974_v47 = vpop.f32.mrf.mxu1  ;;  %v727_v17 = vadd.f32 %v2543_v52, %v708_v41  ;;  %v926_v2 = vadd.f32 %v925_v15, %v2671_v48  ;;  %v710_v25 = vmul.f32 %v2517_v19, %v691_v56 }
 0x1e5   : > { %v636_v22 = vmul.f32 %v1859_v32, %v635_v13  ;;  %v975_v59 = vadd.f32 %v974_v47, %v2673_v1  ;;  %v1611_v49 = vpack.c.bf16 %v1021_v18, %v1019_v55  ;;  %1653 = vst [vmem:[%s2715_s9 + $0x30] sm:$0xff] %v1601_v43  }
 0x1e6   : > { %v739_v53 = vpack.c.bf16 %v728_v11, %v727_v17  ;;  %v729_v62 = vadd.f32 %v2543_v52, %v710_v25 }
 0x1e7   : > { %v1062_v57 = vpack.c.bf16 %v975_v59, %v926_v2  ;;  %v640_v44 = vsel %vm639_vm0, %v1859_v32, %v636_v22  ;;  %1655 = vst [vmem:[%s2700_s26 + $0x40] sm:$0xff] %v1611_v49  }
 0x1e8   : > { %939 = vmatmul.bf16.gmra.mxu0 %v739_v53  ;;  %988 = vmatmul.bf16.gmra.mxu1 %v739_v53  ;;  %v955_v33 = vpop.f32.mrf.mxu3  ;;  %v692_v35 = vmul.f32 %v640_v44, %v2613_v38 }
 0x1e9   : > { %v1124_v16 = vrot.slane %v1062_v57, 4  ;;  %1037 = vmatmul.bf16.gmra.mxu2 %v739_v53  ;;  %v956_v21 = vadd.f32 %v955_v33, %v2671_v48 }
 0x1ea   : > { %v1023_v8 = vpop.f32.mrf.mxu2  ;;  %v711_v45 = vmul.f32 %v2517_v19, %v692_v35 }
 0x1eb   : > { %1156 = vst [vmem:[%s2700_s26 + $0x8] sm:$0xf] %v1124_v16  ;;  %v927_v27 = vpop.f32.mrf.mxu0  ;;  %v1024_v32 = vadd.f32 %v1023_v8, %v2709_v26 }
 0x1ec   : > { %v976_v51 = vpop.f32.mrf.mxu1  ;;  %v928_v54 = vadd.f32 %v927_v27, %v2671_v48  ;;  %v730_v58 = vadd.f32 %v2543_v52, %v711_v45 }
 0x1ed   : > { %v977_v60 = vadd.f32 %v976_v51, %v2673_v1 }
 0x1ee   : > { %v1576_v5 = vpack.c.bf16 %v928_v54, %v926_v2  ;;  %v740_v31 = vpack.c.bf16 %v730_v58, %v729_v62 }
 0x1ef   : > { %v1064_v4 = vpack.c.bf16 %v977_v60, %v928_v54 }
 0x1f0   : > { %1648 = vst [vmem:[%s2715_s9 + $0x8] sm:$0xff] %v1576_v5   ;;  %v957_v38 = vpop.f32.mrf.mxu3 }
 0x1f1   : > { %v1125_v42 = vrot.slane %v1064_v4, 4  ;;  %v958_v12 = vadd.f32 %v957_v38, %v2671_v48 }
 0x1f2   : > { %v1025_v46 = vpop.f32.mrf.mxu2 }
 0x1f3   : > { %1157 = vst [vmem:[%s2700_s26 + $0xc] sm:$0xf] %v1125_v42  ;;  %v1026_v23 = vadd.f32 %v1025_v46, %v2709_v26  ;;  %v930_v40 = vpop.f32.mrf.mxu0  ;;  %v1606_v30 = vpack.c.bf16 %v958_v12, %v956_v21 }
 0x1f4   : > { %v979_v36 = vpop.f32.mrf.mxu1  ;;  %v931_v19 = vadd.f32 %v930_v40, %v2671_v48 }
 0x1f5   : > { %v980_v50 = vadd.f32 %v979_v36, %v2673_v1  ;;  %v1616_v20 = vpack.c.bf16 %v1026_v23, %v1024_v32  ;;  %1654 = vst [vmem:[%s2715_s9 + $0x38] sm:$0xff] %v1606_v30  }
 0x1f7   : > { %v1066_v3 = vpack.c.bf16 %v980_v50, %v931_v19  ;;  %1656 = vst [vmem:[%s2700_s26 + $0x48] sm:$0xff] %v1616_v20  }
 0x1f8   : > { %944 = vmatmul.bf16.gmra.mxu0 %v740_v31  ;;  %993 = vmatmul.bf16.gmra.mxu1 %v740_v31  ;;  %v999_v39 = vpop.f32.mrf.mxu3 }
 0x1f9   : > { %v1126_v9 = vrot.slane %v1066_v3, 4  ;;  %1042 = vmatmul.bf16.gmra.mxu2 %v740_v31  ;;  %v1000_v61 = vadd.f32 %v999_v39, %v2673_v1 }
 0x1fa   : > { %v1028_v37 = vpop.f32.mrf.mxu2 }
 0x1fb   : > { %1158 = vst [vmem:[%s2700_s26 + $0x10] sm:$0xf] %v1126_v9  ;;  %v932_v6 = vpop.f32.mrf.mxu0  ;;  %v1082_v29 = vpack.c.bf16 %v1000_v61, %v2722_v63  ;;  %v1029_v47 = vadd.f32 %v1028_v37, %v2709_v26 }
 0x1fc   : > { %v981_v7 = vpop.f32.mrf.mxu1  ;;  %v933_v52 = vadd.f32 %v932_v6, %v2671_v48 }
 0x1fd   : > { %v982_v41 = vadd.f32 %v981_v7, %v2673_v1  ;;  %v1134_v34 = vrot.slane %v1082_v29, 4 }
 0x1fe   : > { %v1581_v13 = vpack.c.bf16 %v933_v52, %v931_v19 }
 0x1ff   : > { %v1068_v55 = vpack.c.bf16 %v982_v41, %v933_v52  ;;  %1166 = vst [vmem:[%s2700_s26 + $0x30] sm:$0xf] %v1134_v34 }
 0x200   : > { %1649 = vst [vmem:[%s2715_s9 + $0x10] sm:$0xff] %v1581_v13   ;;  %v1001_v18 = vpop.f32.mrf.mxu3 }
 0x201   : > { %v1127_v24 = vrot.slane %v1068_v55, 4  ;;  %v1002_v17 = vadd.f32 %v1001_v18, %v2673_v1 }
 0x202   : > { %v1030_v15 = vpop.f32.mrf.mxu2 }
 0x203   : > { %1159 = vst [vmem:[%s2700_s26 + $0x14] sm:$0xf] %v1127_v24  ;;  %v1031_v11 = vadd.f32 %v1030_v15, %v2709_v26  ;;  %v1084_v63 = vpack.c.bf16 %v1002_v17, %v2727_v14 }
 0x205   : > { %v1621_v22 = vpack.c.bf16 %v1031_v11, %v1029_v47  ;;  %v1135_v2 = vrot.slane %v1084_v63, 4 }
 0x207   : > { %1657 = vst [vmem:[%s2700_s26 + $0x50] sm:$0xff] %v1621_v22  }
 0x208   : > { %1167 = vst [vmem:[%s2700_s26 + $0x34] sm:$0xf] %v1135_v2  ;;  %v1004_v59 = vpop.f32.mrf.mxu3 }
 0x209   : > { %v1005_v43 = vadd.f32 %v1004_v59, %v2673_v1 }
 0x20b   : > { %v1086_v49 = vpack.c.bf16 %v1005_v43, %v956_v21 }
 0x20d   : > { %v1136_v53 = vrot.slane %v1086_v49, 4 }
 0x20f   : > { %1168 = vst [vmem:[%s2700_s26 + $0x38] sm:$0xf] %v1136_v53 }
 0x210   : > { %v1006_v10 = vpop.f32.mrf.mxu3 }
 0x211   : > { %v1007_v28 = vadd.f32 %v1006_v10, %v2673_v1 }
 0x213   : > { %v1088_v57 = vpack.c.bf16 %v1007_v28, %v958_v12 }
 0x215   : > { %v1137_v44 = vrot.slane %v1088_v57, 4 }
 0x217   : > { %1169 = vst [vmem:[%s2700_s26 + $0x3c] sm:$0xf] %v1137_v44 }
 0x218   : > { %v1048_v16 = vpop.f32.mrf.mxu3 }
 0x219   : > { %v1049_v0 = vadd.f32 %v1048_v16, %v2709_v26 }
 0x220   : > { %v1050_v14 = vpop.f32.mrf.mxu3 }
 0x221   : > { %v1051_v33 = vadd.f32 %v1050_v14, %v2709_v26 }
 0x223   : > { %v1641_v8 = vpack.c.bf16 %v1051_v33, %v1049_v0 }
 0x225   : > { %1661 = vst [vmem:[%s2700_s26 + $0x70] sm:$0xff] %v1641_v8  }
 0x228   : > { %v1053_v35 = vpop.f32.mrf.mxu3 }
 0x229   : > { %v1054_v51 = vadd.f32 %v1053_v35, %v2709_v26 }
 0x230   : > { %v1055_v27 = vpop.f32.mrf.mxu3 }
 0x231   : > { %v1056_v54 = vadd.f32 %v1055_v27, %v2709_v26 }
 0x233   : > { %v1646_v60 = vpack.c.bf16 %v1056_v54, %v1054_v51 }
 0x235   : > { %1662 = vst [vmem:[%s2700_s26 + $0x78] sm:$0xff] %v1646_v60  }
 0x255   : > { %v935_v56 = vpop.f32.mrf.mxu0  ;;  %v984_v5 = vpop.f32.mrf.mxu1 }
 0x256   : > { %v936_v4 = vadd.f32 %v935_v56, %v2671_v48  ;;  %v985_v45 = vadd.f32 %v984_v5, %v2673_v1 }
 0x258   : > { %v1070_v42 = vpack.c.bf16 %v985_v45, %v936_v4 }
 0x25a   : > { %v1128_v25 = vrot.slane %v1070_v42, 4 }
 0x25c   : > { %1160 = vst [vmem:[%s2700_s26 + $0x18] sm:$0xf] %v1128_v25  ;;  %v1033_v21 = vpop.f32.mrf.mxu2 }
 0x25d   : > { %v937_v38 = vpop.f32.mrf.mxu0  ;;  %v986_v46 = vpop.f32.mrf.mxu1  ;;  %v1034_v19 = vadd.f32 %v1033_v21, %v2709_v26 }
 0x25e   : > { %v938_v32 = vadd.f32 %v937_v38, %v2671_v48  ;;  %v987_v12 = vadd.f32 %v986_v46, %v2673_v1 }
 0x260   : > { %v1586_v23 = vpack.c.bf16 %v938_v32, %v936_v4  ;;  %v1072_v40 = vpack.c.bf16 %v987_v12, %v938_v32 }
 0x262   : > { %1650 = vst [vmem:[%s2715_s9 + $0x18] sm:$0xff] %v1586_v23   ;;  %v1129_v36 = vrot.slane %v1072_v40, 4 }
 0x264   : > { %1161 = vst [vmem:[%s2700_s26 + $0x1c] sm:$0xf] %v1129_v36  ;;  %v1035_v58 = vpop.f32.mrf.mxu2 }
 0x265   : > { %v1036_v50 = vadd.f32 %v1035_v58, %v2709_v26  ;;  %v940_v30 = vpop.f32.mrf.mxu0  ;;  %v989_v20 = vpop.f32.mrf.mxu1 }
 0x266   : > { %v941_v62 = vadd.f32 %v940_v30, %v2671_v48  ;;  %v990_v3 = vadd.f32 %v989_v20, %v2673_v1 }
 0x267   : > { %v1626_v31 = vpack.c.bf16 %v1036_v50, %v1034_v19 }
 0x268   : > { %v1074_v9 = vpack.c.bf16 %v990_v3, %v941_v62 }
 0x269   : > { %1658 = vst [vmem:[%s2700_s26 + $0x58] sm:$0xff] %v1626_v31  }
 0x26a   : > { %v1130_v39 = vrot.slane %v1074_v9, 4 }
 0x26c   : > { %1162 = vst [vmem:[%s2700_s26 + $0x20] sm:$0xf] %v1130_v39  ;;  %v1038_v37 = vpop.f32.mrf.mxu2 }
 0x26d   : > { %v942_v61 = vpop.f32.mrf.mxu0  ;;  %v991_v6 = vpop.f32.mrf.mxu1  ;;  %v1039_v34 = vadd.f32 %v1038_v37, %v2709_v26 }
 0x26e   : > { %v943_v7 = vadd.f32 %v942_v61, %v2671_v48  ;;  %v992_v52 = vadd.f32 %v991_v6, %v2673_v1 }
 0x270   : > { %v1591_v41 = vpack.c.bf16 %v943_v7, %v941_v62  ;;  %v1076_v29 = vpack.c.bf16 %v992_v52, %v943_v7 }
 0x272   : > { %1651 = vst [vmem:[%s2715_s9 + $0x20] sm:$0xff] %v1591_v41   ;;  %v1131_v13 = vrot.slane %v1076_v29, 4 }
 0x274   : > { %1163 = vst [vmem:[%s2700_s26 + $0x24] sm:$0xf] %v1131_v13  ;;  %v1040_v55 = vpop.f32.mrf.mxu2 }
 0x275   : > { %v1041_v24 = vadd.f32 %v1040_v55, %v2709_v26  ;;  %v945_v18 = vpop.f32.mrf.mxu0  ;;  %v994_v15 = vpop.f32.mrf.mxu1 }
 0x276   : > { %v946_v47 = vadd.f32 %v945_v18, %v2671_v48  ;;  %v995_v17 = vadd.f32 %v994_v15, %v2673_v1 }
 0x277   : > { %v1631_v11 = vpack.c.bf16 %v1041_v24, %v1039_v34 }
 0x278   : > { %v1078_v63 = vpack.c.bf16 %v995_v17, %v946_v47 }
 0x279   : > { %1659 = vst [vmem:[%s2700_s26 + $0x60] sm:$0xff] %v1631_v11  }
 0x27a   : > { %v1132_v22 = vrot.slane %v1078_v63, 4 }
 0x27c   : > { %1164 = vst [vmem:[%s2700_s26 + $0x28] sm:$0xf] %v1132_v22  ;;  %v1043_v2 = vpop.f32.mrf.mxu2 }
 0x27d   : > { %v947_v59 = vpop.f32.mrf.mxu0  ;;  %v996_v43 = vpop.f32.mrf.mxu1 }
 0x27e   : > { %v948_v49 = vadd.f32 %v947_v59, %v2671_v48  ;;  %v997_v53 = vadd.f32 %v996_v43, %v2673_v1 }
 0x280   : > { %v1596_v10 = vpack.c.bf16 %v948_v49, %v946_v47  ;;  %v1080_v28 = vpack.c.bf16 %v997_v53, %v948_v49 }
 0x282   : > { %1652 = vst [vmem:[%s2715_s9 + $0x28] sm:$0xff] %v1596_v10   ;;  %v1133_v57 = vrot.slane %v1080_v28, 4 }
 0x283   : > { %2007 = shalt.err (!%p2004_p13)
}
 0x284   : > { %s2100_s9 = smov 64   ;;  %s2101_s20 = smov 4   ;;  %1165 = vst [vmem:[%s2700_s26 + $0x2c] sm:$0xf] %v1133_v57  ;;  %v1045_v48 = vpop.f32.mrf.mxu2  ;;  %v1044_v1 = vadd.f32 %v1043_v2, %v2709_v26 }
 0x285   : > { %1704 = dma.vmem_to_hbm [thread:$0]  (%p2248_p3), %s1208_s8, 1024, %s1210_s19, %s1188_s29, %s2100_s9, %s2100_s9, %s2101_s20   ;;  %v1046_v44 = vadd.f32 %v1045_v48, %v2709_v26 }
 0x286   : > { %s1193_s11 = scalar_lea.sflag [#allocation12], %s2277_s1 }
 0x287   : > { %v1636_v16 = vpack.c.bf16 %v1046_v44, %v1044_v1 }
 0x289   : > { %1660 = vst [vmem:[%s2700_s26 + $0x68] sm:$0xff] %v1636_v16  }
 0x28a   : > { %s1689_s15 = smul.u32 96, %s2078_s25  ;;  %s1236_s17 = sshll.u32 %s2700_s26, 4  ;;  %s1237_s17 = int_to_ptr.vmem [resolvable:$true] %s1236_s17 }
 0x28b   : > { %s2102_s8 = smov 1024   ;;  %s2940_s12 = sld [smem:[#allocation28_spill]] }
 0x28c   : > { %s1223_s30 = sadd.s32 %s1689_s15, %s1538_s14  ;;  %1705 = sst [smem:[#allocation14]] (%p2248_p3), %s2102_s8 }
 0x28d   : > { %s1541_s19 = sshll.u32 %s1223_s30, 2  ;;  %s2103_s6 = smov 3072  }
 0x28e   : > { %1706 = sst [smem:[#allocation14 + $0x1]] (%p2248_p3), %s2103_s6  ;;  %s2104_s25 = smov 16  }
 0x28f   : > { %1707 = sst [smem:[#allocation14 + $0x2]] (%p2248_p3), %s2104_s25  ;;  %s2105_s24 = smov 64  }
 0x290   : > { %1708 = sst [smem:[#allocation14 + $0x3]] (%p2248_p3), %s2105_s24  ;;  %s2106_s26 = smov 4  }
 0x291   : > { %s1225_s16 = scalar_lea.hbm %s2940_s12, %s1541_s19  ;;  %1709 = sst [smem:[#allocation14 + $0x4]] (%p2248_p3), %s2105_s24 }
 0x292   : > { %s1238_s2 = sshll.u32 %s1225_s16, 4  ;;  %1710 = sst [smem:[#allocation14 + $0x5]] (%p2248_p3), %s2106_s26  ;;  %s1239_s2 = int_to_ptr.hbm [resolvable:$true] %s1238_s2 }
 0x293   : > { %s2107_s14 = smov [#allocation13]   ;;  %s2108_s21 = smov 0  }
 0x294   : > { %1711 = dma.general (%p2248_p3), %s1237_s17, 2048, %s1239_s2, %s1193_s11, %s2107_s14, [#allocation14], %s2108_s21, 0  }
 0x295 PF: > { %s2941_s7 = sld [smem:[#allocation20_spill]]  ;;  %p1742_p0 = scmp.ge.s32.totalorder %s2090_s28, 2 }
 0x297   : > { %p1729_p5 = pnand %p1742_p0, %p2203_p6 }
 0x299   : > { %p1730_p7 = pneg %p1729_p5 }
 0x29b   : > { %s1266_s9 = sand.u32 1, %s2941_s7  }
 0x29c   : > { %s1267_s20 = scalar_lea.sflag [#allocation4], %s1266_s9 }
 0x29d   : > { %2053 = dma.done.wait (%p1730_p7), %s1267_s20, 1024  }
 0x29e   : > { %2055 = vsyncadd (%p1730_p7), %s1267_s20, 4294966272  ;;  %s1277_s15 = scalar_lea.sflag [#allocation12], %s1266_s9 }
 0x29f   : > { %2057 = dma.done.wait (%p1730_p7), %s1277_s15, 2048  }
 0x2a0   : > { %2059 = vsyncadd (%p1730_p7), %s1277_s15, 4294965248  ;;  %s28_s28 = sadd.s32 1, %s2090_s28   ;;  %s2943_s24 = sld [smem:[#allocation21_spill]] }
 0x2a1   : > { %p25_p9 = scmp.ge.s32.totalorder %s28_s28, 8   ;;  %s2944_s26 = sld [smem:[#allocation23_spill]] }
 0x2a2   : > { %s2945_s21 = smov %s2066_s22  ;;  %s2946_s22 = smov %s2070_s23 }
 0x2a3   : > { %s2947_s23 = smov %s2265_s3  ;;  %s2948_s25 = smov %s2086_s27 }
 0x2a4   : > { %s2949_s27 = smov %s2955_s13  ;;  %27 = sbr.rel (!%p25_p9) target bundleno = 16 (0x10), region = 120 }
 0x2a9   :  { %1283 = vsyncpa [#allocation3], 1 }
 0x2aa   :  { %1285 = vsyncpa [#allocation3 + $0x1], 1 }
 0x2ab   :  { %1286 = vsyncpa [#allocation6], 1 }
 0x2ac   :  { %1287 = vsyncpa [#allocation9], 1 }
 0x2ad   :  { %1288 = vsyncpa [#allocation4], 1 }
 0x2ae   :  { %1290 = vsyncpa [#allocation4 + $0x1], 1 }
 0x2af   :  { %1291 = vsyncpa [#allocation12], 1 }
 0x2b0   :  { %1293 = vsyncpa [#allocation12 + $0x1], 1 }

</bundles_post_ra>
